<compile_context>
chip_gen: v6e
topology: v6e:2x2x1
jax: 0.10.0
libtpu: 0.0.40
codegen_flags: <defaults>
</compile_context>

<pallas_src>
import functools
import math

import jax
import jax.numpy as jnp
import numpy as np
from jax.experimental import pallas as pl
from jax.experimental.pallas import tpu as pltpu

# ----------------------------- model dimensions -----------------------------
C_IN = 4           # stacked frames
SPATIAL = 36       # smallest spatial size the canonical Atari trunk accepts
ACTION_DIM = 6
H_DIM = 128        # DuelingHead hidden width (module default is 512)
BATCH = 2
LN_EPS = 1e-5

# canonical AtariBody conv stack: (kernel, stride, out_channels)
# TODO(synk): models.common.AtariBody source is not provided; this is the
# standard Nature-DQN 3-conv trunk (Conv 8/4 -> 4/2 -> 3/1, ReLU, Flatten).
CONV_CFG = ((8, 4, 32), (4, 2, 64), (3, 1, 64))


def _round_up(x, m):
    return (x + m - 1) // m * m


# ------------------------------- Pallas kernel -------------------------------
def _fused_forward_kernel(x_ref,
                          s1_ref, t1_ref, c1_ref,
                          s2_ref, t2_ref, c2_ref,
                          s3_ref, t3_ref, c3_ref,
                          ln_g_ref, ln_b_ref, w_h_ref, b_h_ref,
                          w_qv_ref, b_qv_ref,
                          o_ref, *, action_dim, eps):
    """Whole DuellingAtariNetwork forward for one batch tile, VMEM-resident.

    Each conv layer:  Y = relu( sum_ki (S_ki @ X) @ T_ki + b ) with X the
    lane-dense (rows=batch*height, cols=width*channels) activation slab.
    Only MXU matmuls and elementwise VPU math -- no reshapes or transposes.
    """
    f32 = jnp.float32
    bf16 = jnp.bfloat16
    x = x_ref[...]                                       # (BB*36, 144) bf16
    conv_refs = ((s1_ref, t1_ref, c1_ref),
                 (s2_ref, t2_ref, c2_ref),
                 (s3_ref, t3_ref, c3_ref))
    for (k, _, _), (s_ref, t_ref, c_ref) in zip(CONV_CFG, conv_refs):
        xb = x.astype(bf16)
        acc = None
        for ki in range(k):
            # 0/1 row gather (exact in bf16), then block-Toeplitz weight matmul.
            g = jnp.dot(s_ref[ki], xb, preferred_element_type=f32).astype(bf16)
            p = jnp.dot(g, t_ref[ki], preferred_element_type=f32)
            acc = p if acc is None else acc + p
        x = jnp.maximum(acc + c_ref[...], 0.0)           # f32, lane-dense cols
    feat = x                                             # (BB, 64) f32 == flatten

    # DuelingHead: LayerNorm -> Linear -> GELU -> fused [q | v] -> combine.
    mu = jnp.mean(feat, axis=-1, keepdims=True)
    xc = feat - mu
    var = jnp.mean(xc * xc, axis=-1, keepdims=True)
    xn = xc * jax.lax.rsqrt(var + eps) * ln_g_ref[...] + ln_b_ref[...]
    h = jnp.dot(xn.astype(bf16), w_h_ref[...],
                preferred_element_type=f32) + b_h_ref[...]
    # TODO(synk): PyTorch nn.GELU() default is the exact erf form; the tanh
    # approximation is used here for robust Mosaic (EUP) lowering.
    h = jax.nn.gelu(h)
    qv = jnp.dot(h.astype(bf16), w_qv_ref[...],
                 preferred_element_type=f32) + b_qv_ref[...]     # (BB, A+1)
    q = qv[:, :action_dim]
    v = qv[:, action_dim:action_dim + 1]
    o_ref[...] = v + q - jnp.mean(q, axis=-1, keepdims=True)


# ------------------------------ host-side glue -------------------------------
def duelling_atari_forward(s, consts):
    """s: (B, C, H, W) pixels in [0, 255]; consts: output of pack_params."""
    bsz, cin, hh, ww = s.shape
    assert cin == C_IN and hh == SPATIAL and ww == SPATIAL
    batch_block = consts[0].shape[2] // SPATIAL          # baked into S matrices
    assert bsz % batch_block == 0
    # NCHW -> lane-dense (B*H, W*C) slab (pure data movement); pixel integers
    # are exact in bf16 and the 1/255 scale lives in the conv1 weights.
    x = jnp.transpose(s.astype(jnp.bfloat16), (0, 2, 3, 1)).reshape(
        bsz * SPATIAL, SPATIAL * C_IN)
    in_specs = [pl.BlockSpec((batch_block * SPATIAL, SPATIAL * C_IN),
                             lambda i: (i, 0))]
    # Constants: full-array VMEM blocks with constant index maps -> fetched once,
    # never re-pipelined across grid steps.
    in_specs += [pl.BlockSpec(c.shape, lambda i, _n=c.ndim: (0,) * _n)
                 for c in consts]
    return pl.pallas_call(
        functools.partial(_fused_forward_kernel,
                          action_dim=ACTION_DIM, eps=LN_EPS),
        out_shape=jax.ShapeDtypeStruct((bsz, ACTION_DIM), jnp.float32),
        grid=(bsz // batch_block,),                      # 1 step at demo size
        in_specs=in_specs,
        out_specs=pl.BlockSpec((batch_block, ACTION_DIM), lambda i: (i, 0)),
        compiler_params=pltpu.CompilerParams(
            dimension_semantics=("parallel",)),          # batch tiles -> TCs
    )(x, *consts)


# --------------------- constant construction (init time) ---------------------
def _pack_conv(w, b, k, stride, h_in, w_in, rows_in, bb, scale, pad_out):
    """Row-selection + block-Toeplitz matrices for one conv layer."""
    c_out, c_in = int(w.shape[0]), int(w.shape[1])
    h_out = (h_in - k) // stride + 1
    w_out = (w_in - k) // stride + 1
    # Pad the output row count to a multiple of 8 so the next layer's gather
    # matmul has an aligned K dim (padded rows are all-zero selections and are
    # never referenced downstream).
    rows_out = _round_up(bb * h_out, 8) if pad_out else bb * h_out
    s_mat = np.zeros((k, rows_out, rows_in), np.float32)
    for ki in range(k):
        for bi in range(bb):
            for oh in range(h_out):
                s_mat[ki, bi * h_out + oh, bi * h_in + stride * oh + ki] = 1.0
    wnp = np.asarray(w, np.float32) * scale               # (Cout, Cin, k, k)
    t_mat = np.zeros((k, w_in * c_in, w_out * c_out), np.float32)
    for ki in range(k):
        for ow in range(w_out):
            for kj in range(k):
                col = stride * ow + kj
                t_mat[ki, col * c_in:(col + 1) * c_in,
                      ow * c_out:(ow + 1) * c_out] = wnp[:, :, ki, kj].T
    b_row = np.tile(np.asarray(b, np.float32), w_out)[None, :]
    return (jnp.asarray(s_mat, jnp.bfloat16),
            jnp.asarray(t_mat, jnp.bfloat16),
            jnp.asarray(b_row, jnp.float32), h_out, w_out, rows_out)


def pack_params(params, batch_block):
    """Build kernel-layout constant operands from PyTorch-layout params."""
    consts = []
    h = w = SPATIAL
    rows = batch_block * SPATIAL
    scale = 1.0 / 255.0                                   # fold s/255 into conv1
    n_conv = len(CONV_CFG)
    for li, (k, stride, _) in enumerate(CONV_CFG):
        s_m, t_m, b_r, h, w, rows = _pack_conv(
            params[f"w_conv{li}"], params[f"b_conv{li}"], k, stride, h, w,
            rows, batch_block, scale, pad_out=(li + 1 < n_conv))
        consts += [s_m, t_m, b_r]
        scale = 1.0
    # The canonical trunk ends at 1x1 spatial, so conv3's output IS the
    # flattened body feature and the head fuses directly after it.
    # TODO(synk): a non-1x1 trunk output would need an NHWC->NCHW flatten stage.
    assert h == 1 and w == 1
    consts += [
        params["ln_g"].reshape(1, -1).astype(jnp.float32),
        params["ln_b"].reshape(1, -1).astype(jnp.float32),
        params["w_body"].T.astype(jnp.bfloat16),                  # (F, H)
        params["b_body"].reshape(1, -1).astype(jnp.float32),
        jnp.concatenate([params["w_q"].T, params["w_v"].T],
                        axis=1).astype(jnp.bfloat16),             # (H, A+1)
        jnp.concatenate([params["b_q"], params["b_v"]]
                        ).reshape(1, -1).astype(jnp.float32),
    ]
    return tuple(consts)


# --------------------------------- params ------------------------------------
def _trunc_init(key, shape, fan_in):
    # deterministic stand-in for models.common.layer_init_truncated
    std = 1.0 / math.sqrt(fan_in)
    return std * jax.random.truncated_normal(key, -2.0, 2.0, shape, jnp.float32)


def init_params(key):
    keys = jax.random.split(key, 6)
    params = {}
    cin = C_IN
    for li, (k, _, cout) in enumerate(CONV_CFG):
        fan_in = cin * k * k
        params[f"w_conv{li}"] = _trunc_init(keys[li], (cout, cin, k, k), fan_in)
        params[f"b_conv{li}"] = jnp.zeros((cout,), jnp.float32)
        cin = cout
    h = w = SPATIAL
    for k, stride, cout in CONV_CFG:
        h = (h - k) // stride + 1
        w = (w - k) // stride + 1
    feat_dim = cin * h * w
    params["ln_g"] = jnp.ones((feat_dim,), jnp.float32)
    params["ln_b"] = jnp.zeros((feat_dim,), jnp.float32)
    params["w_body"] = _trunc_init(keys[3], (H_DIM, feat_dim), feat_dim)
    params["b_body"] = jnp.zeros((H_DIM,), jnp.float32)
    params["w_q"] = _trunc_init(keys[4], (ACTION_DIM, H_DIM), H_DIM)
    params["b_q"] = jnp.zeros((ACTION_DIM,), jnp.float32)
    params["w_v"] = _trunc_init(keys[5], (1, H_DIM), H_DIM)
    params["b_v"] = jnp.zeros((1,), jnp.float32)
    return params


# ------------------------- pure-JAX reference (f32) ---------------------------
def _reference_forward(s, params):
    x = s.astype(jnp.float32) / 255.0
    for li, (k, stride, _) in enumerate(CONV_CFG):
        x = jax.lax.conv_general_dilated(
            x, params[f"w_conv{li}"], (stride, stride), "VALID",
            dimension_numbers=("NCHW", "OIHW", "NCHW"))
        x = jnp.maximum(x + params[f"b_conv{li}"][None, :, None, None], 0.0)
    feat = x.reshape(x.shape[0], -1)
    mu = feat.mean(-1, keepdims=True)
    var = ((feat - mu) ** 2).mean(-1, keepdims=True)
    xn = (feat - mu) * jax.lax.rsqrt(var + LN_EPS) * params["ln_g"] + params["ln_b"]
    h = jax.nn.gelu(xn @ params["w_body"].T + params["b_body"])
    q = h @ params["w_q"].T + params["b_q"]
    v = h @ params["w_v"].T + params["b_v"]
    return v + q - q.mean(-1, keepdims=True)


if __name__ == "__main__":
    key = jax.random.PRNGKey(0)
    ks, kp = jax.random.split(key)
    # Atari-style observation: stacked frames with pixel values in [0, 255].
    s = jax.random.randint(ks, (BATCH, C_IN, SPATIAL, SPATIAL), 0, 256
                           ).astype(jnp.float32)
    params = init_params(kp)
    # batch_block == BATCH => grid of 1 at demo size (review: don't split tiny
    # work); use a smaller batch_block at production batch sizes for v7x dual-TC.
    consts = pack_params(params, batch_block=BATCH)

    fwd = jax.jit(duelling_atari_forward)
    q = jax.block_until_ready(fwd(s, consts))

    q_ref = _reference_forward(s, params)
    assert q.shape == (BATCH, ACTION_DIM)
    assert bool(jnp.all(jnp.isfinite(q)))
    # bf16 MXU operands => small deviation from the f32 reference is expected.
    assert bool(jnp.allclose(q, q_ref, atol=0.1, rtol=0.1)), (q, q_ref)
    print("KERNEL_OK")
</pallas_src>

<mosaic_0001>
module attributes {stable_mosaic.version = 11 : i64} {
  func.func @_fused_forward_kernel(%arg0: i32, %arg1: memref<72x144xbf16, #tpu.memory_space<vmem>>, %arg2: memref<8x16x72xbf16, #tpu.memory_space<vmem>>, %arg3: memref<8x144x256xbf16, #tpu.memory_space<vmem>>, %arg4: memref<1x256xf32, #tpu.memory_space<vmem>>, %arg5: memref<4x8x16xbf16, #tpu.memory_space<vmem>>, %arg6: memref<4x256x192xbf16, #tpu.memory_space<vmem>>, %arg7: memref<1x192xf32, #tpu.memory_space<vmem>>, %arg8: memref<3x2x8xbf16, #tpu.memory_space<vmem>>, %arg9: memref<3x192x64xbf16, #tpu.memory_space<vmem>>, %arg10: memref<1x64xf32, #tpu.memory_space<vmem>>, %arg11: memref<1x64xf32, #tpu.memory_space<vmem>>, %arg12: memref<1x64xf32, #tpu.memory_space<vmem>>, %arg13: memref<64x128xbf16, #tpu.memory_space<vmem>>, %arg14: memref<1x128xf32, #tpu.memory_space<vmem>>, %arg15: memref<128x7xbf16, #tpu.memory_space<vmem>>, %arg16: memref<1x7xf32, #tpu.memory_space<vmem>>, %arg17: memref<2x6xf32, #tpu.memory_space<vmem>>) attributes {dimension_semantics = [#tpu.dimension_semantics<parallel>], iteration_bounds = array<i64: 1>, scalar_prefetch = 0 : i64, scratch_operands = 0 : i64, tpu.core_type = #tpu.core_type<tc>, window_params = [{transform_indices = @transform_0, window_bounds = array<i64: 72, 144>}, {pipeline_mode = #tpu.pipeline_mode<synchronous>, transform_indices = @transform_1, window_bounds = array<i64: 8, 16, 72>}, {pipeline_mode = #tpu.pipeline_mode<synchronous>, transform_indices = @transform_2, window_bounds = array<i64: 8, 144, 256>}, {pipeline_mode = #tpu.pipeline_mode<synchronous>, transform_indices = @transform_3, window_bounds = array<i64: 1, 256>}, {pipeline_mode = #tpu.pipeline_mode<synchronous>, transform_indices = @transform_4, window_bounds = array<i64: 4, 8, 16>}, {pipeline_mode = #tpu.pipeline_mode<synchronous>, transform_indices = @transform_5, window_bounds = array<i64: 4, 256, 192>}, {pipeline_mode = #tpu.pipeline_mode<synchronous>, transform_indices = @transform_6, window_bounds = array<i64: 1, 192>}, {pipeline_mode = #tpu.pipeline_mode<synchronous>, transform_indices = @transform_7, window_bounds = array<i64: 3, 2, 8>}, {pipeline_mode = #tpu.pipeline_mode<synchronous>, transform_indices = @transform_8, window_bounds = array<i64: 3, 192, 64>}, {pipeline_mode = #tpu.pipeline_mode<synchronous>, transform_indices = @transform_9, window_bounds = array<i64: 1, 64>}, {pipeline_mode = #tpu.pipeline_mode<synchronous>, transform_indices = @transform_10, window_bounds = array<i64: 1, 64>}, {pipeline_mode = #tpu.pipeline_mode<synchronous>, transform_indices = @transform_11, window_bounds = array<i64: 1, 64>}, {pipeline_mode = #tpu.pipeline_mode<synchronous>, transform_indices = @transform_12, window_bounds = array<i64: 64, 128>}, {pipeline_mode = #tpu.pipeline_mode<synchronous>, transform_indices = @transform_13, window_bounds = array<i64: 1, 128>}, {pipeline_mode = #tpu.pipeline_mode<synchronous>, transform_indices = @transform_14, window_bounds = array<i64: 128, 7>}, {pipeline_mode = #tpu.pipeline_mode<synchronous>, transform_indices = @transform_15, window_bounds = array<i64: 1, 7>}, {transform_indices = @transform_16, window_bounds = array<i64: 2, 6>}]} {
    %c0 = arith.constant 0 : index
    %c0_0 = arith.constant 0 : index
    %0 = vector.load %arg1[%c0, %c0_0] : memref<72x144xbf16, #tpu.memory_space<vmem>>, vector<72x144xbf16>
    %c0_1 = arith.constant 0 : index
    %c0_2 = arith.constant 0 : index
    %c0_3 = arith.constant 0 : index
    %1 = vector.load %arg2[%c0_1, %c0_2, %c0_3] : memref<8x16x72xbf16, #tpu.memory_space<vmem>>, vector<1x16x72xbf16>
    %2 = vector.shape_cast %1 : vector<1x16x72xbf16> to vector<16x72xbf16>
    %cst = arith.constant dense<0.000000e+00> : vector<16x144xf32>
    %3 = tpu.matmul %2, %0, %cst {dimension_numbers = #tpu.dot_dimension_numbers<[1], [0], [0], [1], [0, 0, 1, 1], [], []>} : vector<16x72xbf16>, vector<72x144xbf16>, vector<16x144xf32> -> vector<16x144xf32>
    %4 = arith.truncf %3 : vector<16x144xf32> to vector<16x144xbf16>
    %c0_4 = arith.constant 0 : index
    %c0_5 = arith.constant 0 : index
    %c0_6 = arith.constant 0 : index
    %5 = vector.load %arg3[%c0_4, %c0_5, %c0_6] : memref<8x144x256xbf16, #tpu.memory_space<vmem>>, vector<1x144x256xbf16>
    %6 = vector.shape_cast %5 : vector<1x144x256xbf16> to vector<144x256xbf16>
    %cst_7 = arith.constant dense<0.000000e+00> : vector<16x256xf32>
    %7 = tpu.matmul %4, %6, %cst_7 {dimension_numbers = #tpu.dot_dimension_numbers<[1], [0], [0], [1], [0, 0, 1, 1], [], []>} : vector<16x144xbf16>, vector<144x256xbf16>, vector<16x256xf32> -> vector<16x256xf32>
    %c1 = arith.constant 1 : index
    %c0_8 = arith.constant 0 : index
    %c0_9 = arith.constant 0 : index
    %8 = vector.load %arg2[%c1, %c0_8, %c0_9] : memref<8x16x72xbf16, #tpu.memory_space<vmem>>, vector<1x16x72xbf16>
    %9 = vector.shape_cast %8 : vector<1x16x72xbf16> to vector<16x72xbf16>
    %cst_10 = arith.constant dense<0.000000e+00> : vector<16x144xf32>
    %10 = tpu.matmul %9, %0, %cst_10 {dimension_numbers = #tpu.dot_dimension_numbers<[1], [0], [0], [1], [0, 0, 1, 1], [], []>} : vector<16x72xbf16>, vector<72x144xbf16>, vector<16x144xf32> -> vector<16x144xf32>
    %11 = arith.truncf %10 : vector<16x144xf32> to vector<16x144xbf16>
    %c1_11 = arith.constant 1 : index
    %c0_12 = arith.constant 0 : index
    %c0_13 = arith.constant 0 : index
    %12 = vector.load %arg3[%c1_11, %c0_12, %c0_13] : memref<8x144x256xbf16, #tpu.memory_space<vmem>>, vector<1x144x256xbf16>
    %13 = vector.shape_cast %12 : vector<1x144x256xbf16> to vector<144x256xbf16>
    %cst_14 = arith.constant dense<0.000000e+00> : vector<16x256xf32>
    %14 = tpu.matmul %11, %13, %cst_14 {dimension_numbers = #tpu.dot_dimension_numbers<[1], [0], [0], [1], [0, 0, 1, 1], [], []>} : vector<16x144xbf16>, vector<144x256xbf16>, vector<16x256xf32> -> vector<16x256xf32>
    %15 = arith.addf %7, %14 : vector<16x256xf32>
    %c2 = arith.constant 2 : index
    %c0_15 = arith.constant 0 : index
    %c0_16 = arith.constant 0 : index
    %16 = vector.load %arg2[%c2, %c0_15, %c0_16] : memref<8x16x72xbf16, #tpu.memory_space<vmem>>, vector<1x16x72xbf16>
    %17 = vector.shape_cast %16 : vector<1x16x72xbf16> to vector<16x72xbf16>
    %cst_17 = arith.constant dense<0.000000e+00> : vector<16x144xf32>
    %18 = tpu.matmul %17, %0, %cst_17 {dimension_numbers = #tpu.dot_dimension_numbers<[1], [0], [0], [1], [0, 0, 1, 1], [], []>} : vector<16x72xbf16>, vector<72x144xbf16>, vector<16x144xf32> -> vector<16x144xf32>
    %19 = arith.truncf %18 : vector<16x144xf32> to vector<16x144xbf16>
    %c2_18 = arith.constant 2 : index
    %c0_19 = arith.constant 0 : index
    %c0_20 = arith.constant 0 : index
    %20 = vector.load %arg3[%c2_18, %c0_19, %c0_20] : memref<8x144x256xbf16, #tpu.memory_space<vmem>>, vector<1x144x256xbf16>
    %21 = vector.shape_cast %20 : vector<1x144x256xbf16> to vector<144x256xbf16>
    %cst_21 = arith.constant dense<0.000000e+00> : vector<16x256xf32>
    %22 = tpu.matmul %19, %21, %cst_21 {dimension_numbers = #tpu.dot_dimension_numbers<[1], [0], [0], [1], [0, 0, 1, 1], [], []>} : vector<16x144xbf16>, vector<144x256xbf16>, vector<16x256xf32> -> vector<16x256xf32>
    %23 = arith.addf %15, %22 : vector<16x256xf32>
    %c3 = arith.constant 3 : index
    %c0_22 = arith.constant 0 : index
    %c0_23 = arith.constant 0 : index
    %24 = vector.load %arg2[%c3, %c0_22, %c0_23] : memref<8x16x72xbf16, #tpu.memory_space<vmem>>, vector<1x16x72xbf16>
    %25 = vector.shape_cast %24 : vector<1x16x72xbf16> to vector<16x72xbf16>
    %cst_24 = arith.constant dense<0.000000e+00> : vector<16x144xf32>
    %26 = tpu.matmul %25, %0, %cst_24 {dimension_numbers = #tpu.dot_dimension_numbers<[1], [0], [0], [1], [0, 0, 1, 1], [], []>} : vector<16x72xbf16>, vector<72x144xbf16>, vector<16x144xf32> -> vector<16x144xf32>
    %27 = arith.truncf %26 : vector<16x144xf32> to vector<16x144xbf16>
    %c3_25 = arith.constant 3 : index
    %c0_26 = arith.constant 0 : index
    %c0_27 = arith.constant 0 : index
    %28 = vector.load %arg3[%c3_25, %c0_26, %c0_27] : memref<8x144x256xbf16, #tpu.memory_space<vmem>>, vector<1x144x256xbf16>
    %29 = vector.shape_cast %28 : vector<1x144x256xbf16> to vector<144x256xbf16>
    %cst_28 = arith.constant dense<0.000000e+00> : vector<16x256xf32>
    %30 = tpu.matmul %27, %29, %cst_28 {dimension_numbers = #tpu.dot_dimension_numbers<[1], [0], [0], [1], [0, 0, 1, 1], [], []>} : vector<16x144xbf16>, vector<144x256xbf16>, vector<16x256xf32> -> vector<16x256xf32>
    %31 = arith.addf %23, %30 : vector<16x256xf32>
    %c4 = arith.constant 4 : index
    %c0_29 = arith.constant 0 : index
    %c0_30 = arith.constant 0 : index
    %32 = vector.load %arg2[%c4, %c0_29, %c0_30] : memref<8x16x72xbf16, #tpu.memory_space<vmem>>, vector<1x16x72xbf16>
    %33 = vector.shape_cast %32 : vector<1x16x72xbf16> to vector<16x72xbf16>
    %cst_31 = arith.constant dense<0.000000e+00> : vector<16x144xf32>
    %34 = tpu.matmul %33, %0, %cst_31 {dimension_numbers = #tpu.dot_dimension_numbers<[1], [0], [0], [1], [0, 0, 1, 1], [], []>} : vector<16x72xbf16>, vector<72x144xbf16>, vector<16x144xf32> -> vector<16x144xf32>
    %35 = arith.truncf %34 : vector<16x144xf32> to vector<16x144xbf16>
    %c4_32 = arith.constant 4 : index
    %c0_33 = arith.constant 0 : index
    %c0_34 = arith.constant 0 : index
    %36 = vector.load %arg3[%c4_32, %c0_33, %c0_34] : memref<8x144x256xbf16, #tpu.memory_space<vmem>>, vector<1x144x256xbf16>
    %37 = vector.shape_cast %36 : vector<1x144x256xbf16> to vector<144x256xbf16>
    %cst_35 = arith.constant dense<0.000000e+00> : vector<16x256xf32>
    %38 = tpu.matmul %35, %37, %cst_35 {dimension_numbers = #tpu.dot_dimension_numbers<[1], [0], [0], [1], [0, 0, 1, 1], [], []>} : vector<16x144xbf16>, vector<144x256xbf16>, vector<16x256xf32> -> vector<16x256xf32>
    %39 = arith.addf %31, %38 : vector<16x256xf32>
    %c5 = arith.constant 5 : index
    %c0_36 = arith.constant 0 : index
    %c0_37 = arith.constant 0 : index
    %40 = vector.load %arg2[%c5, %c0_36, %c0_37] : memref<8x16x72xbf16, #tpu.memory_space<vmem>>, vector<1x16x72xbf16>
    %41 = vector.shape_cast %40 : vector<1x16x72xbf16> to vector<16x72xbf16>
    %cst_38 = arith.constant dense<0.000000e+00> : vector<16x144xf32>
    %42 = tpu.matmul %41, %0, %cst_38 {dimension_numbers = #tpu.dot_dimension_numbers<[1], [0], [0], [1], [0, 0, 1, 1], [], []>} : vector<16x72xbf16>, vector<72x144xbf16>, vector<16x144xf32> -> vector<16x144xf32>
    %43 = arith.truncf %42 : vector<16x144xf32> to vector<16x144xbf16>
    %c5_39 = arith.constant 5 : index
    %c0_40 = arith.constant 0 : index
    %c0_41 = arith.constant 0 : index
    %44 = vector.load %arg3[%c5_39, %c0_40, %c0_41] : memref<8x144x256xbf16, #tpu.memory_space<vmem>>, vector<1x144x256xbf16>
    %45 = vector.shape_cast %44 : vector<1x144x256xbf16> to vector<144x256xbf16>
    %cst_42 = arith.constant dense<0.000000e+00> : vector<16x256xf32>
    %46 = tpu.matmul %43, %45, %cst_42 {dimension_numbers = #tpu.dot_dimension_numbers<[1], [0], [0], [1], [0, 0, 1, 1], [], []>} : vector<16x144xbf16>, vector<144x256xbf16>, vector<16x256xf32> -> vector<16x256xf32>
    %47 = arith.addf %39, %46 : vector<16x256xf32>
    %c6 = arith.constant 6 : index
    %c0_43 = arith.constant 0 : index
    %c0_44 = arith.constant 0 : index
    %48 = vector.load %arg2[%c6, %c0_43, %c0_44] : memref<8x16x72xbf16, #tpu.memory_space<vmem>>, vector<1x16x72xbf16>
    %49 = vector.shape_cast %48 : vector<1x16x72xbf16> to vector<16x72xbf16>
    %cst_45 = arith.constant dense<0.000000e+00> : vector<16x144xf32>
    %50 = tpu.matmul %49, %0, %cst_45 {dimension_numbers = #tpu.dot_dimension_numbers<[1], [0], [0], [1], [0, 0, 1, 1], [], []>} : vector<16x72xbf16>, vector<72x144xbf16>, vector<16x144xf32> -> vector<16x144xf32>
    %51 = arith.truncf %50 : vector<16x144xf32> to vector<16x144xbf16>
    %c6_46 = arith.constant 6 : index
    %c0_47 = arith.constant 0 : index
    %c0_48 = arith.constant 0 : index
    %52 = vector.load %arg3[%c6_46, %c0_47, %c0_48] : memref<8x144x256xbf16, #tpu.memory_space<vmem>>, vector<1x144x256xbf16>
    %53 = vector.shape_cast %52 : vector<1x144x256xbf16> to vector<144x256xbf16>
    %cst_49 = arith.constant dense<0.000000e+00> : vector<16x256xf32>
    %54 = tpu.matmul %51, %53, %cst_49 {dimension_numbers = #tpu.dot_dimension_numbers<[1], [0], [0], [1], [0, 0, 1, 1], [], []>} : vector<16x144xbf16>, vector<144x256xbf16>, vector<16x256xf32> -> vector<16x256xf32>
    %55 = arith.addf %47, %54 : vector<16x256xf32>
    %c7 = arith.constant 7 : index
    %c0_50 = arith.constant 0 : index
    %c0_51 = arith.constant 0 : index
    %56 = vector.load %arg2[%c7, %c0_50, %c0_51] : memref<8x16x72xbf16, #tpu.memory_space<vmem>>, vector<1x16x72xbf16>
    %57 = vector.shape_cast %56 : vector<1x16x72xbf16> to vector<16x72xbf16>
    %cst_52 = arith.constant dense<0.000000e+00> : vector<16x144xf32>
    %58 = tpu.matmul %57, %0, %cst_52 {dimension_numbers = #tpu.dot_dimension_numbers<[1], [0], [0], [1], [0, 0, 1, 1], [], []>} : vector<16x72xbf16>, vector<72x144xbf16>, vector<16x144xf32> -> vector<16x144xf32>
    %59 = arith.truncf %58 : vector<16x144xf32> to vector<16x144xbf16>
    %c7_53 = arith.constant 7 : index
    %c0_54 = arith.constant 0 : index
    %c0_55 = arith.constant 0 : index
    %60 = vector.load %arg3[%c7_53, %c0_54, %c0_55] : memref<8x144x256xbf16, #tpu.memory_space<vmem>>, vector<1x144x256xbf16>
    %61 = vector.shape_cast %60 : vector<1x144x256xbf16> to vector<144x256xbf16>
    %cst_56 = arith.constant dense<0.000000e+00> : vector<16x256xf32>
    %62 = tpu.matmul %59, %61, %cst_56 {dimension_numbers = #tpu.dot_dimension_numbers<[1], [0], [0], [1], [0, 0, 1, 1], [], []>} : vector<16x144xbf16>, vector<144x256xbf16>, vector<16x256xf32> -> vector<16x256xf32>
    %63 = arith.addf %55, %62 : vector<16x256xf32>
    %c0_57 = arith.constant 0 : index
    %c0_58 = arith.constant 0 : index
    %64 = vector.load %arg4[%c0_57, %c0_58] : memref<1x256xf32, #tpu.memory_space<vmem>>, vector<1x256xf32>
    %65 = vector.broadcast %64 : vector<1x256xf32> to vector<16x256xf32>
    %66 = arith.addf %63, %65 : vector<16x256xf32>
    %cst_59 = arith.constant 0.000000e+00 : f32
    %67 = vector.broadcast %cst_59 : f32 to vector<16x256xf32>
    %68 = arith.maximumf %66, %67 : vector<16x256xf32>
    %69 = arith.truncf %68 : vector<16x256xf32> to vector<16x256xbf16>
    %c0_60 = arith.constant 0 : index
    %c0_61 = arith.constant 0 : index
    %c0_62 = arith.constant 0 : index
    %70 = vector.load %arg5[%c0_60, %c0_61, %c0_62] : memref<4x8x16xbf16, #tpu.memory_space<vmem>>, vector<1x8x16xbf16>
    %71 = vector.shape_cast %70 : vector<1x8x16xbf16> to vector<8x16xbf16>
    %cst_63 = arith.constant dense<0.000000e+00> : vector<8x256xf32>
    %72 = tpu.matmul %71, %69, %cst_63 {dimension_numbers = #tpu.dot_dimension_numbers<[1], [0], [0], [1], [0, 0, 1, 1], [], []>} : vector<8x16xbf16>, vector<16x256xbf16>, vector<8x256xf32> -> vector<8x256xf32>
    %73 = arith.truncf %72 : vector<8x256xf32> to vector<8x256xbf16>
    %c0_64 = arith.constant 0 : index
    %c0_65 = arith.constant 0 : index
    %c0_66 = arith.constant 0 : index
    %74 = vector.load %arg6[%c0_64, %c0_65, %c0_66] : memref<4x256x192xbf16, #tpu.memory_space<vmem>>, vector<1x256x192xbf16>
    %75 = vector.shape_cast %74 : vector<1x256x192xbf16> to vector<256x192xbf16>
    %cst_67 = arith.constant dense<0.000000e+00> : vector<8x192xf32>
    %76 = tpu.matmul %73, %75, %cst_67 {dimension_numbers = #tpu.dot_dimension_numbers<[1], [0], [0], [1], [0, 0, 1, 1], [], []>} : vector<8x256xbf16>, vector<256x192xbf16>, vector<8x192xf32> -> vector<8x192xf32>
    %c1_68 = arith.constant 1 : index
    %c0_69 = arith.constant 0 : index
    %c0_70 = arith.constant 0 : index
    %77 = vector.load %arg5[%c1_68, %c0_69, %c0_70] : memref<4x8x16xbf16, #tpu.memory_space<vmem>>, vector<1x8x16xbf16>
    %78 = vector.shape_cast %77 : vector<1x8x16xbf16> to vector<8x16xbf16>
    %cst_71 = arith.constant dense<0.000000e+00> : vector<8x256xf32>
    %79 = tpu.matmul %78, %69, %cst_71 {dimension_numbers = #tpu.dot_dimension_numbers<[1], [0], [0], [1], [0, 0, 1, 1], [], []>} : vector<8x16xbf16>, vector<16x256xbf16>, vector<8x256xf32> -> vector<8x256xf32>
    %80 = arith.truncf %79 : vector<8x256xf32> to vector<8x256xbf16>
    %c1_72 = arith.constant 1 : index
    %c0_73 = arith.constant 0 : index
    %c0_74 = arith.constant 0 : index
    %81 = vector.load %arg6[%c1_72, %c0_73, %c0_74] : memref<4x256x192xbf16, #tpu.memory_space<vmem>>, vector<1x256x192xbf16>
    %82 = vector.shape_cast %81 : vector<1x256x192xbf16> to vector<256x192xbf16>
    %cst_75 = arith.constant dense<0.000000e+00> : vector<8x192xf32>
    %83 = tpu.matmul %80, %82, %cst_75 {dimension_numbers = #tpu.dot_dimension_numbers<[1], [0], [0], [1], [0, 0, 1, 1], [], []>} : vector<8x256xbf16>, vector<256x192xbf16>, vector<8x192xf32> -> vector<8x192xf32>
    %84 = arith.addf %76, %83 : vector<8x192xf32>
    %c2_76 = arith.constant 2 : index
    %c0_77 = arith.constant 0 : index
    %c0_78 = arith.constant 0 : index
    %85 = vector.load %arg5[%c2_76, %c0_77, %c0_78] : memref<4x8x16xbf16, #tpu.memory_space<vmem>>, vector<1x8x16xbf16>
    %86 = vector.shape_cast %85 : vector<1x8x16xbf16> to vector<8x16xbf16>
    %cst_79 = arith.constant dense<0.000000e+00> : vector<8x256xf32>
    %87 = tpu.matmul %86, %69, %cst_79 {dimension_numbers = #tpu.dot_dimension_numbers<[1], [0], [0], [1], [0, 0, 1, 1], [], []>} : vector<8x16xbf16>, vector<16x256xbf16>, vector<8x256xf32> -> vector<8x256xf32>
    %88 = arith.truncf %87 : vector<8x256xf32> to vector<8x256xbf16>
    %c2_80 = arith.constant 2 : index
    %c0_81 = arith.constant 0 : index
    %c0_82 = arith.constant 0 : index
    %89 = vector.load %arg6[%c2_80, %c0_81, %c0_82] : memref<4x256x192xbf16, #tpu.memory_space<vmem>>, vector<1x256x192xbf16>
    %90 = vector.shape_cast %89 : vector<1x256x192xbf16> to vector<256x192xbf16>
    %cst_83 = arith.constant dense<0.000000e+00> : vector<8x192xf32>
    %91 = tpu.matmul %88, %90, %cst_83 {dimension_numbers = #tpu.dot_dimension_numbers<[1], [0], [0], [1], [0, 0, 1, 1], [], []>} : vector<8x256xbf16>, vector<256x192xbf16>, vector<8x192xf32> -> vector<8x192xf32>
    %92 = arith.addf %84, %91 : vector<8x192xf32>
    %c3_84 = arith.constant 3 : index
    %c0_85 = arith.constant 0 : index
    %c0_86 = arith.constant 0 : index
    %93 = vector.load %arg5[%c3_84, %c0_85, %c0_86] : memref<4x8x16xbf16, #tpu.memory_space<vmem>>, vector<1x8x16xbf16>
    %94 = vector.shape_cast %93 : vector<1x8x16xbf16> to vector<8x16xbf16>
    %cst_87 = arith.constant dense<0.000000e+00> : vector<8x256xf32>
    %95 = tpu.matmul %94, %69, %cst_87 {dimension_numbers = #tpu.dot_dimension_numbers<[1], [0], [0], [1], [0, 0, 1, 1], [], []>} : vector<8x16xbf16>, vector<16x256xbf16>, vector<8x256xf32> -> vector<8x256xf32>
    %96 = arith.truncf %95 : vector<8x256xf32> to vector<8x256xbf16>
    %c3_88 = arith.constant 3 : index
    %c0_89 = arith.constant 0 : index
    %c0_90 = arith.constant 0 : index
    %97 = vector.load %arg6[%c3_88, %c0_89, %c0_90] : memref<4x256x192xbf16, #tpu.memory_space<vmem>>, vector<1x256x192xbf16>
    %98 = vector.shape_cast %97 : vector<1x256x192xbf16> to vector<256x192xbf16>
    %cst_91 = arith.constant dense<0.000000e+00> : vector<8x192xf32>
    %99 = tpu.matmul %96, %98, %cst_91 {dimension_numbers = #tpu.dot_dimension_numbers<[1], [0], [0], [1], [0, 0, 1, 1], [], []>} : vector<8x256xbf16>, vector<256x192xbf16>, vector<8x192xf32> -> vector<8x192xf32>
    %100 = arith.addf %92, %99 : vector<8x192xf32>
    %c0_92 = arith.constant 0 : index
    %c0_93 = arith.constant 0 : index
    %101 = vector.load %arg7[%c0_92, %c0_93] : memref<1x192xf32, #tpu.memory_space<vmem>>, vector<1x192xf32>
    %102 = vector.broadcast %101 : vector<1x192xf32> to vector<8x192xf32>
    %103 = arith.addf %100, %102 : vector<8x192xf32>
    %cst_94 = arith.constant 0.000000e+00 : f32
    %104 = vector.broadcast %cst_94 : f32 to vector<8x192xf32>
    %105 = arith.maximumf %103, %104 : vector<8x192xf32>
    %106 = arith.truncf %105 : vector<8x192xf32> to vector<8x192xbf16>
    %c0_95 = arith.constant 0 : index
    %c0_96 = arith.constant 0 : index
    %c0_97 = arith.constant 0 : index
    %107 = vector.load %arg8[%c0_95, %c0_96, %c0_97] : memref<3x2x8xbf16, #tpu.memory_space<vmem>>, vector<1x2x8xbf16>
    %108 = vector.shape_cast %107 : vector<1x2x8xbf16> to vector<2x8xbf16>
    %cst_98 = arith.constant dense<0.000000e+00> : vector<2x192xf32>
    %109 = tpu.matmul %108, %106, %cst_98 {dimension_numbers = #tpu.dot_dimension_numbers<[1], [0], [0], [1], [0, 0, 1, 1], [], []>} : vector<2x8xbf16>, vector<8x192xbf16>, vector<2x192xf32> -> vector<2x192xf32>
    %110 = arith.truncf %109 : vector<2x192xf32> to vector<2x192xbf16>
    %c0_99 = arith.constant 0 : index
    %c0_100 = arith.constant 0 : index
    %c0_101 = arith.constant 0 : index
    %111 = vector.load %arg9[%c0_99, %c0_100, %c0_101] : memref<3x192x64xbf16, #tpu.memory_space<vmem>>, vector<1x192x64xbf16>
    %112 = vector.shape_cast %111 : vector<1x192x64xbf16> to vector<192x64xbf16>
    %cst_102 = arith.constant dense<0.000000e+00> : vector<2x64xf32>
    %113 = tpu.matmul %110, %112, %cst_102 {dimension_numbers = #tpu.dot_dimension_numbers<[1], [0], [0], [1], [0, 0, 1, 1], [], []>} : vector<2x192xbf16>, vector<192x64xbf16>, vector<2x64xf32> -> vector<2x64xf32>
    %c1_103 = arith.constant 1 : index
    %c0_104 = arith.constant 0 : index
    %c0_105 = arith.constant 0 : index
    %114 = vector.load %arg8[%c1_103, %c0_104, %c0_105] : memref<3x2x8xbf16, #tpu.memory_space<vmem>>, vector<1x2x8xbf16>
    %115 = vector.shape_cast %114 : vector<1x2x8xbf16> to vector<2x8xbf16>
    %cst_106 = arith.constant dense<0.000000e+00> : vector<2x192xf32>
    %116 = tpu.matmul %115, %106, %cst_106 {dimension_numbers = #tpu.dot_dimension_numbers<[1], [0], [0], [1], [0, 0, 1, 1], [], []>} : vector<2x8xbf16>, vector<8x192xbf16>, vector<2x192xf32> -> vector<2x192xf32>
    %117 = arith.truncf %116 : vector<2x192xf32> to vector<2x192xbf16>
    %c1_107 = arith.constant 1 : index
    %c0_108 = arith.constant 0 : index
    %c0_109 = arith.constant 0 : index
    %118 = vector.load %arg9[%c1_107, %c0_108, %c0_109] : memref<3x192x64xbf16, #tpu.memory_space<vmem>>, vector<1x192x64xbf16>
    %119 = vector.shape_cast %118 : vector<1x192x64xbf16> to vector<192x64xbf16>
    %cst_110 = arith.constant dense<0.000000e+00> : vector<2x64xf32>
    %120 = tpu.matmul %117, %119, %cst_110 {dimension_numbers = #tpu.dot_dimension_numbers<[1], [0], [0], [1], [0, 0, 1, 1], [], []>} : vector<2x192xbf16>, vector<192x64xbf16>, vector<2x64xf32> -> vector<2x64xf32>
    %121 = arith.addf %113, %120 : vector<2x64xf32>
    %c2_111 = arith.constant 2 : index
    %c0_112 = arith.constant 0 : index
    %c0_113 = arith.constant 0 : index
    %122 = vector.load %arg8[%c2_111, %c0_112, %c0_113] : memref<3x2x8xbf16, #tpu.memory_space<vmem>>, vector<1x2x8xbf16>
    %123 = vector.shape_cast %122 : vector<1x2x8xbf16> to vector<2x8xbf16>
    %cst_114 = arith.constant dense<0.000000e+00> : vector<2x192xf32>
    %124 = tpu.matmul %123, %106, %cst_114 {dimension_numbers = #tpu.dot_dimension_numbers<[1], [0], [0], [1], [0, 0, 1, 1], [], []>} : vector<2x8xbf16>, vector<8x192xbf16>, vector<2x192xf32> -> vector<2x192xf32>
    %125 = arith.truncf %124 : vector<2x192xf32> to vector<2x192xbf16>
    %c2_115 = arith.constant 2 : index
    %c0_116 = arith.constant 0 : index
    %c0_117 = arith.constant 0 : index
    %126 = vector.load %arg9[%c2_115, %c0_116, %c0_117] : memref<3x192x64xbf16, #tpu.memory_space<vmem>>, vector<1x192x64xbf16>
    %127 = vector.shape_cast %126 : vector<1x192x64xbf16> to vector<192x64xbf16>
    %cst_118 = arith.constant dense<0.000000e+00> : vector<2x64xf32>
    %128 = tpu.matmul %125, %127, %cst_118 {dimension_numbers = #tpu.dot_dimension_numbers<[1], [0], [0], [1], [0, 0, 1, 1], [], []>} : vector<2x192xbf16>, vector<192x64xbf16>, vector<2x64xf32> -> vector<2x64xf32>
    %129 = arith.addf %121, %128 : vector<2x64xf32>
    %c0_119 = arith.constant 0 : index
    %c0_120 = arith.constant 0 : index
    %130 = vector.load %arg10[%c0_119, %c0_120] : memref<1x64xf32, #tpu.memory_space<vmem>>, vector<1x64xf32>
    %131 = vector.broadcast %130 : vector<1x64xf32> to vector<2x64xf32>
    %132 = arith.addf %129, %131 : vector<2x64xf32>
    %cst_121 = arith.constant 0.000000e+00 : f32
    %133 = vector.broadcast %cst_121 : f32 to vector<2x64xf32>
    %134 = arith.maximumf %132, %133 : vector<2x64xf32>
    %cst_122 = arith.constant dense<0.000000e+00> : vector<2xf32>
    %135 = vector.multi_reduction <add>, %134, %cst_122 [1] : vector<2x64xf32> to vector<2xf32>
    %136 = vector.shape_cast %135 : vector<2xf32> to vector<2x1xf32>
    %cst_123 = arith.constant 6.400000e+01 : f32
    %137 = vector.broadcast %cst_123 : f32 to vector<2x1xf32>
    %138 = arith.divf %136, %137 : vector<2x1xf32>
    %139 = vector.broadcast %138 : vector<2x1xf32> to vector<2x64xf32>
    %140 = arith.subf %134, %139 : vector<2x64xf32>
    %141 = arith.mulf %140, %140 : vector<2x64xf32>
    %cst_124 = arith.constant dense<0.000000e+00> : vector<2xf32>
    %142 = vector.multi_reduction <add>, %141, %cst_124 [1] : vector<2x64xf32> to vector<2xf32>
    %143 = vector.shape_cast %142 : vector<2xf32> to vector<2x1xf32>
    %cst_125 = arith.constant 6.400000e+01 : f32
    %144 = vector.broadcast %cst_125 : f32 to vector<2x1xf32>
    %145 = arith.divf %143, %144 : vector<2x1xf32>
    %cst_126 = arith.constant 9.99999974E-6 : f32
    %146 = vector.broadcast %cst_126 : f32 to vector<2x1xf32>
    %147 = arith.addf %145, %146 : vector<2x1xf32>
    %148 = math.rsqrt %147 : vector<2x1xf32>
    %149 = vector.broadcast %148 : vector<2x1xf32> to vector<2x64xf32>
    %150 = arith.mulf %140, %149 : vector<2x64xf32>
    %c0_127 = arith.constant 0 : index
    %c0_128 = arith.constant 0 : index
    %151 = vector.load %arg11[%c0_127, %c0_128] : memref<1x64xf32, #tpu.memory_space<vmem>>, vector<1x64xf32>
    %152 = vector.broadcast %151 : vector<1x64xf32> to vector<2x64xf32>
    %153 = arith.mulf %150, %152 : vector<2x64xf32>
    %c0_129 = arith.constant 0 : index
    %c0_130 = arith.constant 0 : index
    %154 = vector.load %arg12[%c0_129, %c0_130] : memref<1x64xf32, #tpu.memory_space<vmem>>, vector<1x64xf32>
    %155 = vector.broadcast %154 : vector<1x64xf32> to vector<2x64xf32>
    %156 = arith.addf %153, %155 : vector<2x64xf32>
    %157 = arith.truncf %156 : vector<2x64xf32> to vector<2x64xbf16>
    %c0_131 = arith.constant 0 : index
    %c0_132 = arith.constant 0 : index
    %158 = vector.load %arg13[%c0_131, %c0_132] : memref<64x128xbf16, #tpu.memory_space<vmem>>, vector<64x128xbf16>
    %cst_133 = arith.constant dense<0.000000e+00> : vector<2x128xf32>
    %159 = tpu.matmul %157, %158, %cst_133 {dimension_numbers = #tpu.dot_dimension_numbers<[1], [0], [0], [1], [0, 0, 1, 1], [], []>} : vector<2x64xbf16>, vector<64x128xbf16>, vector<2x128xf32> -> vector<2x128xf32>
    %c0_134 = arith.constant 0 : index
    %c0_135 = arith.constant 0 : index
    %160 = vector.load %arg14[%c0_134, %c0_135] : memref<1x128xf32, #tpu.memory_space<vmem>>, vector<1x128xf32>
    %161 = vector.broadcast %160 : vector<1x128xf32> to vector<2x128xf32>
    %162 = arith.addf %159, %161 : vector<2x128xf32>
    %163 = arith.mulf %162, %162 : vector<2x128xf32>
    %164 = arith.mulf %162, %163 : vector<2x128xf32>
    %cst_136 = arith.constant 4.471500e-02 : f32
    %165 = vector.broadcast %cst_136 : f32 to vector<2x128xf32>
    %166 = arith.mulf %165, %164 : vector<2x128xf32>
    %167 = arith.addf %162, %166 : vector<2x128xf32>
    %cst_137 = arith.constant 0.797884583 : f32
    %168 = vector.broadcast %cst_137 : f32 to vector<2x128xf32>
    %169 = arith.mulf %168, %167 : vector<2x128xf32>
    %170 = math.tanh %169 : vector<2x128xf32>
    %cst_138 = arith.constant 1.000000e+00 : f32
    %171 = vector.broadcast %cst_138 : f32 to vector<2x128xf32>
    %172 = arith.addf %171, %170 : vector<2x128xf32>
    %cst_139 = arith.constant 5.000000e-01 : f32
    %173 = vector.broadcast %cst_139 : f32 to vector<2x128xf32>
    %174 = arith.mulf %173, %172 : vector<2x128xf32>
    %175 = arith.mulf %162, %174 : vector<2x128xf32>
    %176 = arith.truncf %175 : vector<2x128xf32> to vector<2x128xbf16>
    %c0_140 = arith.constant 0 : index
    %c0_141 = arith.constant 0 : index
    %177 = vector.load %arg15[%c0_140, %c0_141] : memref<128x7xbf16, #tpu.memory_space<vmem>>, vector<128x7xbf16>
    %cst_142 = arith.constant dense<0.000000e+00> : vector<2x7xf32>
    %178 = tpu.matmul %176, %177, %cst_142 {dimension_numbers = #tpu.dot_dimension_numbers<[1], [0], [0], [1], [0, 0, 1, 1], [], []>} : vector<2x128xbf16>, vector<128x7xbf16>, vector<2x7xf32> -> vector<2x7xf32>
    %c0_143 = arith.constant 0 : index
    %c0_144 = arith.constant 0 : index
    %179 = vector.load %arg16[%c0_143, %c0_144] : memref<1x7xf32, #tpu.memory_space<vmem>>, vector<1x7xf32>
    %180 = vector.broadcast %179 : vector<1x7xf32> to vector<2x7xf32>
    %181 = arith.addf %178, %180 : vector<2x7xf32>
    %182 = vector.extract_strided_slice %181 {offsets = [0, 0], sizes = [2, 6], strides = [1, 1]} : vector<2x7xf32> to vector<2x6xf32>
    %183 = vector.extract_strided_slice %181 {offsets = [0, 6], sizes = [2, 1], strides = [1, 1]} : vector<2x7xf32> to vector<2x1xf32>
    %184 = vector.broadcast %183 : vector<2x1xf32> to vector<2x6xf32>
    %185 = arith.addf %184, %182 : vector<2x6xf32>
    %cst_145 = arith.constant dense<0.000000e+00> : vector<2xf32>
    %186 = vector.multi_reduction <add>, %182, %cst_145 [1] : vector<2x6xf32> to vector<2xf32>
    %187 = vector.shape_cast %186 : vector<2xf32> to vector<2x1xf32>
    %cst_146 = arith.constant 6.000000e+00 : f32
    %188 = vector.broadcast %cst_146 : f32 to vector<2x1xf32>
    %189 = arith.divf %187, %188 : vector<2x1xf32>
    %190 = vector.broadcast %189 : vector<2x1xf32> to vector<2x6xf32>
    %191 = arith.subf %185, %190 : vector<2x6xf32>
    %c0_147 = arith.constant 0 : index
    %c0_148 = arith.constant 0 : index
    %192 = vector.load %arg17[%c0_147, %c0_148] : memref<2x6xf32, #tpu.memory_space<vmem>>, vector<2x6xf32>
    tpu.vector_store %arg17[%c0_147, %c0_148], %191 {strides = array<i32>} : memref<2x6xf32, #tpu.memory_space<vmem>>, vector<2x6xf32>,
    return
  }
  func.func @transform_0(%arg0: i32) -> (i32, i32) {
    %c0_i32 = arith.constant 0 : i32
    %c0_i32_0 = arith.constant 0 : i32
    return %arg0, %c0_i32 : i32, i32
  }
  func.func @transform_1(%arg0: i32) -> (i32, i32, i32) {
    %c0_i32 = arith.constant 0 : i32
    %c0_i32_0 = arith.constant 0 : i32
    %c0_i32_1 = arith.constant 0 : i32
    %c0_i32_2 = arith.constant 0 : i32
    return %c0_i32, %c0_i32_0, %c0_i32_1 : i32, i32, i32
  }
  func.func @transform_2(%arg0: i32) -> (i32, i32, i32) {
    %c0_i32 = arith.constant 0 : i32
    %c0_i32_0 = arith.constant 0 : i32
    %c0_i32_1 = arith.constant 0 : i32
    %c0_i32_2 = arith.constant 0 : i32
    return %c0_i32, %c0_i32_0, %c0_i32_1 : i32, i32, i32
  }
  func.func @transform_3(%arg0: i32) -> (i32, i32) {
    %c0_i32 = arith.constant 0 : i32
    %c0_i32_0 = arith.constant 0 : i32
    %c0_i32_1 = arith.constant 0 : i32
    return %c0_i32, %c0_i32_0 : i32, i32
  }
  func.func @transform_4(%arg0: i32) -> (i32, i32, i32) {
    %c0_i32 = arith.constant 0 : i32
    %c0_i32_0 = arith.constant 0 : i32
    %c0_i32_1 = arith.constant 0 : i32
    %c0_i32_2 = arith.constant 0 : i32
    return %c0_i32, %c0_i32_0, %c0_i32_1 : i32, i32, i32
  }
  func.func @transform_5(%arg0: i32) -> (i32, i32, i32) {
    %c0_i32 = arith.constant 0 : i32
    %c0_i32_0 = arith.constant 0 : i32
    %c0_i32_1 = arith.constant 0 : i32
    %c0_i32_2 = arith.constant 0 : i32
    return %c0_i32, %c0_i32_0, %c0_i32_1 : i32, i32, i32
  }
  func.func @transform_6(%arg0: i32) -> (i32, i32) {
    %c0_i32 = arith.constant 0 : i32
    %c0_i32_0 = arith.constant 0 : i32
    %c0_i32_1 = arith.constant 0 : i32
    return %c0_i32, %c0_i32_0 : i32, i32
  }
  func.func @transform_7(%arg0: i32) -> (i32, i32, i32) {
    %c0_i32 = arith.constant 0 : i32
    %c0_i32_0 = arith.constant 0 : i32
    %c0_i32_1 = arith.constant 0 : i32
    %c0_i32_2 = arith.constant 0 : i32
    return %c0_i32, %c0_i32_0, %c0_i32_1 : i32, i32, i32
  }
  func.func @transform_8(%arg0: i32) -> (i32, i32, i32) {
    %c0_i32 = arith.constant 0 : i32
    %c0_i32_0 = arith.constant 0 : i32
    %c0_i32_1 = arith.constant 0 : i32
    %c0_i32_2 = arith.constant 0 : i32
    return %c0_i32, %c0_i32_0, %c0_i32_1 : i32, i32, i32
  }
  func.func @transform_9(%arg0: i32) -> (i32, i32) {
    %c0_i32 = arith.constant 0 : i32
    %c0_i32_0 = arith.constant 0 : i32
    %c0_i32_1 = arith.constant 0 : i32
    return %c0_i32, %c0_i32_0 : i32, i32
  }
  func.func @transform_10(%arg0: i32) -> (i32, i32) {
    %c0_i32 = arith.constant 0 : i32
    %c0_i32_0 = arith.constant 0 : i32
    %c0_i32_1 = arith.constant 0 : i32
    return %c0_i32, %c0_i32_0 : i32, i32
  }
  func.func @transform_11(%arg0: i32) -> (i32, i32) {
    %c0_i32 = arith.constant 0 : i32
    %c0_i32_0 = arith.constant 0 : i32
    %c0_i32_1 = arith.constant 0 : i32
    return %c0_i32, %c0_i32_0 : i32, i32
  }
  func.func @transform_12(%arg0: i32) -> (i32, i32) {
    %c0_i32 = arith.constant 0 : i32
    %c0_i32_0 = arith.constant 0 : i32
    %c0_i32_1 = arith.constant 0 : i32
    return %c0_i32, %c0_i32_0 : i32, i32
  }
  func.func @transform_13(%arg0: i32) -> (i32, i32) {
    %c0_i32 = arith.constant 0 : i32
    %c0_i32_0 = arith.constant 0 : i32
    %c0_i32_1 = arith.constant 0 : i32
    return %c0_i32, %c0_i32_0 : i32, i32
  }
  func.func @transform_14(%arg0: i32) -> (i32, i32) {
    %c0_i32 = arith.constant 0 : i32
    %c0_i32_0 = arith.constant 0 : i32
    %c0_i32_1 = arith.constant 0 : i32
    return %c0_i32, %c0_i32_0 : i32, i32
  }
  func.func @transform_15(%arg0: i32) -> (i32, i32) {
    %c0_i32 = arith.constant 0 : i32
    %c0_i32_0 = arith.constant 0 : i32
    %c0_i32_1 = arith.constant 0 : i32
    return %c0_i32, %c0_i32_0 : i32, i32
  }
  func.func @transform_16(%arg0: i32) -> (i32, i32) {
    %c0_i32 = arith.constant 0 : i32
    %c0_i32_0 = arith.constant 0 : i32
    return %arg0, %c0_i32 : i32, i32
  }
}

</mosaic_0001>

<bundles_post_ra>
// kernel: duelling_atari_forward.1
= control target key start
LH: loop header
LB: loop body
LE: loop exit
PB: predicated region body
PF: predicated region fallthrough
CT: control target
= control target key end

     0   :  { %s6514_s0 = inlined_call_operand.vmem [shape: bf16[72,144], index: 0, kind: input, shape index: {}]   ;;  %s6515_s1 = inlined_call_operand.vmem [shape: bf16[8,16,72], index: 1, kind: input, shape index: {}]   ;;  %s6516_s2 = inlined_call_operand.vmem [shape: bf16[8,144,256], index: 2, kind: input, shape index: {}]   ;;  %s6517_s3 = inlined_call_operand.vmem [shape: f32[1,256], index: 3, kind: input, shape index: {}]   ;;  %s6518_s4 = inlined_call_operand.vmem [shape: bf16[4,8,16], index: 4, kind: input, shape index: {}]   ;;  %s6519_s5 = inlined_call_operand.vmem [shape: bf16[4,256,192], index: 5, kind: input, shape index: {}]   ;;  %s6520_s6 = inlined_call_operand.vmem [shape: f32[1,192], index: 6, kind: input, shape index: {}]   ;;  %s6521_s7 = inlined_call_operand.vmem [shape: bf16[3,2,8], index: 7, kind: input, shape index: {}]   ;;  %s6522_s8 = inlined_call_operand.vmem [shape: bf16[3,192,64], index: 8, kind: input, shape index: {}]   ;;  %s6523_s9 = inlined_call_operand.vmem [shape: f32[1,64], index: 9, kind: input, shape index: {}]   ;;  %s6524_s10 = inlined_call_operand.vmem [shape: f32[1,64], index: 10, kind: input, shape index: {}]   ;;  %s6525_s11 = inlined_call_operand.vmem [shape: f32[1,64], index: 11, kind: input, shape index: {}]   ;;  %s6526_s12 = inlined_call_operand.vmem [shape: bf16[64,128], index: 12, kind: input, shape index: {}]   ;;  %s6527_s13 = inlined_call_operand.vmem [shape: f32[1,128], index: 13, kind: input, shape index: {}]   ;;  %s6528_s14 = inlined_call_operand.vmem [shape: bf16[128,7], index: 14, kind: input, shape index: {}]   ;;  %s6529_s15 = inlined_call_operand.vmem [shape: f32[1,7], index: 15, kind: input, shape index: {}]   ;;  %s6530_s16 = inlined_call_operand.hbm [shape: f32[2,6], index: 16, kind: output, shape index: {}]  }
   0x1   :  { %6532 = sst [smem:[#allocation5_spill]] %s6514_s0 }
   0x2   :  { %s6533_s23 = sld [smem:[#allocation5_spill]]  ;;  %vm120_vm0 = vcmask 1043456   ;;  %v5076_v4 = vmov 0   ;;  %v4582_v13 = vld [vmem:[%s6516_s2 + $0x104] ss:$8 sps:$4 sm:$0xff]   ;;  %vm116_vm1 = vcmask 588800  }
   0x3   :  { %159 = vmatprep.mubr.bf16.mxu0 %v5076_v4  ;;  %233 = vmatprep.mubr.bf16.mxu1 %v5076_v4  ;;  %v4585_v14 = vld [vmem:[%s6516_s2 + $0x74] ss:$8 sps:$4 sm:$0xff]   ;;  %v4578_v15 = vld [vmem:[%s6515_s1] sm:$0xff]   ;;  %v4579_v16 = vld [vmem:[%s6515_s1 + $0x8] sm:$0xff]  }
   0x4   :  { %v4580_v17 = vld [vmem:[%s6516_s2 + $0x100] ss:$8 sps:$4 sm:$0xff]   ;;  %v4583_v18 = vld [vmem:[%s6516_s2 + $0x70] ss:$8 sps:$4 sm:$0xff]   ;;  %v4588_v19 = vld [vmem:[%s6516_s2 + $0xf4] ss:$8 sps:$4 sm:$0xff]  }
   0x5   :  { %v4591_v20 = vld [vmem:[%s6516_s2 + $0x64] ss:$8 sps:$4 sm:$0xff]   ;;  %v4586_v21 = vld [vmem:[%s6516_s2 + $0xf0] ss:$8 sps:$4 sm:$0xff]   ;;  %v4589_v22 = vld [vmem:[%s6516_s2 + $0x60] ss:$8 sps:$4 sm:$0xff]  }
   0x6   :  { %v4594_v23 = vld [vmem:[%s6516_s2 + $0xe4] ss:$8 sps:$4 sm:$0xff]   ;;  %v4597_v24 = vld [vmem:[%s6516_s2 + $0x54] ss:$8 sps:$4 sm:$0xff]   ;;  %v4592_v25 = vld [vmem:[%s6516_s2 + $0xe0] ss:$8 sps:$4 sm:$0xff]  }
   0x7   :  { %v4595_v26 = vld [vmem:[%s6516_s2 + $0x50] ss:$8 sps:$4 sm:$0xff]   ;;  %v4600_v27 = vld [vmem:[%s6516_s2 + $0xd4] ss:$8 sps:$4 sm:$0xff]   ;;  %v4603_v28 = vld [vmem:[%s6516_s2 + $0x44] ss:$8 sps:$4 sm:$0xff]  }
   0x8   :  { %v63_v0 = vld [vmem:[%s6533_s23 + $0x40] sm:$0xff]  ;;  %v4566_v3 = vld [vmem:[%s6533_s23 + $0x34] ss:$8 sps:$4 sm:$0xff]   ;;  %v4568_v6 = vld [vmem:[%s6533_s23 + $0x30] ss:$8 sps:$4 sm:$0xff]  }
   0x9   :  { %v5169_v1 = vcombine.high %v63_v0, %v63_v0  ;;  %v3850_v2 = vcombine.low %v63_v0, %v63_v0  ;;  %v5191_v7 = vld [vmem:[%s6533_s23 + $0x24] ss:$8 sps:$4 sm:$0xff]   ;;  %v5196_v8 = vld [vmem:[%s6533_s23 + $0x20] ss:$8 sps:$4 sm:$0xff]   ;;  %v5203_v9 = vld [vmem:[%s6533_s23 + $0x14] ss:$8 sps:$4 sm:$0xff]  }
   0xa   :  { %v5210_v10 = vld [vmem:[%s6533_s23 + $0x10] ss:$8 sps:$4 sm:$0xff]   ;;  %v5217_v11 = vld [vmem:[%s6533_s23 + $0x4] ss:$8 sps:$4 sm:$0xff]   ;;  %v5224_v12 = vld [vmem:[%s6533_s23] ss:$8 sps:$4 sm:$0xff]  }
   0xb   :  { %3852 = vmatprep.subr.msk.bf16.mxu0 %vm120_vm0, %v5169_v1  ;;  %3857 = vmatprep.subr.msk.bf16.mxu1 %vm120_vm0, %v5169_v1  ;;  %v5181_v5 = vsel %vm120_vm0, %v3850_v2, 0  ;;  %v4598_v29 = vld [vmem:[%s6516_s2 + $0xd0] ss:$8 sps:$4 sm:$0xff]   ;;  %v4601_v30 = vld [vmem:[%s6516_s2 + $0x40] ss:$8 sps:$4 sm:$0xff]  }
   0xc   :  { %134 = vmatpush1.bf16.msra.mxu0 %v5181_v5  ;;  %208 = vmatpush1.bf16.msra.mxu1 %v5181_v5  ;;  %v4606_v31 = vld [vmem:[%s6516_s2 + $0xc4] ss:$8 sps:$4 sm:$0xff]   ;;  %v4609_v32 = vld [vmem:[%s6516_s2 + $0x34] ss:$8 sps:$4 sm:$0xff]   ;;  %v4604_v33 = vld [vmem:[%s6516_s2 + $0xc0] ss:$8 sps:$4 sm:$0xff]  }
   0xd   :  { %135 = vmatprep.subr.bf16.mxu0 %v4566_v3  ;;  %209 = vmatprep.subr.bf16.mxu1 %v4566_v3  ;;  %v4607_v34 = vld [vmem:[%s6516_s2 + $0x30] ss:$8 sps:$4 sm:$0xff]   ;;  %v4612_v35 = vld [vmem:[%s6516_s2 + $0xb4] ss:$8 sps:$4 sm:$0xff]   ;;  %v4615_v36 = vld [vmem:[%s6516_s2 + $0x24] ss:$8 sps:$4 sm:$0xff]  }
   0xe   :  { %v4610_v37 = vld [vmem:[%s6516_s2 + $0xb0] ss:$8 sps:$4 sm:$0xff]   ;;  %v4613_v38 = vld [vmem:[%s6516_s2 + $0x20] ss:$8 sps:$4 sm:$0xff]   ;;  %v4618_v39 = vld [vmem:[%s6516_s2 + $0xa4] ss:$8 sps:$4 sm:$0xff]  }
   0xf   :  { %v4621_v40 = vld [vmem:[%s6516_s2 + $0x14] ss:$8 sps:$4 sm:$0xff]   ;;  %v4616_v41 = vld [vmem:[%s6516_s2 + $0xa0] ss:$8 sps:$4 sm:$0xff]   ;;  %v4619_v42 = vld [vmem:[%s6516_s2 + $0x10] ss:$8 sps:$4 sm:$0xff]  }
  0x10   :  { %136 = vmatpush1.bf16.msra.mxu0 %v4568_v6  ;;  %210 = vmatpush1.bf16.msra.mxu1 %v4568_v6  ;;  %v4624_v43 = vld [vmem:[%s6516_s2 + $0x94] ss:$8 sps:$4 sm:$0xff]   ;;  %v4622_v44 = vld [vmem:[%s6516_s2 + $0x90] ss:$8 sps:$4 sm:$0xff]   ;;  %v4627_v45 = vld [vmem:[%s6516_s2 + $0x4] ss:$8 sps:$4 sm:$0xff]  }
  0x11   :  { %137 = vmatprep.subr.bf16.mxu0 %v5191_v7  ;;  %211 = vmatprep.subr.bf16.mxu1 %v5191_v7  ;;  %v4625_v46 = vld [vmem:[%s6516_s2] ss:$8 sps:$4 sm:$0xff]   ;;  %v4630_v47 = vld [vmem:[%s6516_s2 + $0x114] ss:$8 sps:$4 sm:$0xff]   ;;  %v4628_v48 = vld [vmem:[%s6516_s2 + $0x110] ss:$8 sps:$4 sm:$0xff]  }
  0x12   :  { %v4633_v49 = vld [vmem:[%s6516_s2 + $0x84] ss:$8 sps:$4 sm:$0xff]   ;;  %v4631_v50 = vld [vmem:[%s6516_s2 + $0x80] ss:$8 sps:$4 sm:$0xff]  }
  0x14   :  { %138 = vmatpush1.bf16.msra.mxu0 %v5196_v8  ;;  %212 = vmatpush1.bf16.msra.mxu1 %v5196_v8 }
  0x15   :  { %139 = vmatprep.subr.bf16.mxu0 %v5203_v9  ;;  %213 = vmatprep.subr.bf16.mxu1 %v5203_v9 }
  0x18   :  { %140 = vmatpush1.bf16.msra.mxu0 %v5210_v10  ;;  %214 = vmatpush1.bf16.msra.mxu1 %v5210_v10 }
  0x19   :  { %141 = vmatprep.subr.bf16.mxu0 %v5217_v11  ;;  %215 = vmatprep.subr.bf16.mxu1 %v5217_v11 }
  0x1c   :  { %142 = vmatpush1.bf16.msra.mxu0 %v5224_v12  ;;  %216 = vmatpush1.bf16.msra.mxu1 %v5224_v12 }
  0x1d   :  { %359 = vmatprep.subr.bf16.mxu0 %v4582_v13  ;;  %495 = vmatprep.subr.bf16.mxu1 %v4585_v14 }
  0x1f   :  { %3853 = vmatmul.mubr.msk.bf16.vlgmr.msra.gmra.mxu0 %vm116_vm1, %v4578_v15  ;;  %3858 = vmatmul.mubr.msk.bf16.vlgmr.msra.gmra.mxu1 %vm116_vm1, %v4579_v16 }
  0x20   :  { %360 = vmatpush1.bf16.msra.mxu0 %v4580_v17  ;;  %496 = vmatpush1.bf16.msra.mxu1 %v4583_v18 }
  0x21   :  { %361 = vmatprep.subr.bf16.mxu0 %v4588_v19  ;;  %497 = vmatprep.subr.bf16.mxu1 %v4591_v20 }
  0x24   :  { %362 = vmatpush1.bf16.msra.mxu0 %v4586_v21  ;;  %498 = vmatpush1.bf16.msra.mxu1 %v4589_v22 }
  0x25   :  { %363 = vmatprep.subr.bf16.mxu0 %v4594_v23  ;;  %499 = vmatprep.subr.bf16.mxu1 %v4597_v24 }
  0x28   :  { %364 = vmatpush1.bf16.msra.mxu0 %v4592_v25  ;;  %500 = vmatpush1.bf16.msra.mxu1 %v4595_v26 }
  0x29   :  { %365 = vmatprep.subr.bf16.mxu0 %v4600_v27  ;;  %501 = vmatprep.subr.bf16.mxu1 %v4603_v28 }
  0x2c   :  { %366 = vmatpush1.bf16.msra.mxu0 %v4598_v29  ;;  %502 = vmatpush1.bf16.msra.mxu1 %v4601_v30 }
  0x2d   :  { %367 = vmatprep.subr.bf16.mxu0 %v4606_v31  ;;  %503 = vmatprep.subr.bf16.mxu1 %v4609_v32 }
  0x30   :  { %368 = vmatpush1.bf16.msra.mxu0 %v4604_v33  ;;  %504 = vmatpush1.bf16.msra.mxu1 %v4607_v34 }
  0x31   :  { %369 = vmatprep.subr.bf16.mxu0 %v4612_v35  ;;  %505 = vmatprep.subr.bf16.mxu1 %v4615_v36 }
  0x34   :  { %370 = vmatpush1.bf16.msra.mxu0 %v4610_v37  ;;  %506 = vmatpush1.bf16.msra.mxu1 %v4613_v38 }
  0x35   :  { %371 = vmatprep.subr.bf16.mxu0 %v4618_v39  ;;  %507 = vmatprep.subr.bf16.mxu1 %v4621_v40 }
  0x38   :  { %372 = vmatpush1.bf16.msra.mxu0 %v4616_v41  ;;  %508 = vmatpush1.bf16.msra.mxu1 %v4619_v42 }
  0x39   :  { %373 = vmatprep.subr.bf16.mxu0 %v4624_v43  ;;  %509 = vmatprep.subr.bf16.mxu1 %v4627_v45 }
  0x3c   :  { %374 = vmatpush1.bf16.msra.mxu0 %v4622_v44  ;;  %510 = vmatpush1.bf16.msra.mxu1 %v4625_v46 }
  0x3d   :  { %389 = vmatprep.subr.bf16.mxu0 %v4630_v47  ;;  %525 = vmatprep.subr.bf16.mxu1 %v4633_v49 }
  0x40   :  { %390 = vmatpush2.bf16.msra.mxu0 %v4628_v48  ;;  %526 = vmatpush2.bf16.msra.mxu1 %v4631_v50 }
  0x41   :  { %3918 = vmatprep.subr.msk.bf16.mxu0 %vm120_vm0, %v5169_v1 }
  0x42   :  { %21 = vsyncpa [#allocation3], 0  ;;  %v4639_v51 = vld [vmem:[%s6516_s2 + $0x194] ss:$8 sps:$4 sm:$0xff]   ;;  %vm355_vm2 = vcmask 130048   ;;  %vm2999_vm3 = vcmask 64512  }
  0x43   :  { %706 = vmatprep.subr.bf16.mxu1 %v4639_v51  ;;  %v4637_v0 = vld [vmem:[%s6516_s2 + $0x190] ss:$8 sps:$4 sm:$0xff]   ;;  %v4642_v2 = vld [vmem:[%s6516_s2 + $0x184] ss:$8 sps:$4 sm:$0xff]   ;;  %v5364_v3 = vld [vmem:[%s6533_s23 + $0x34] ss:$8 sps:$4 sm:$0xff]  }
  0x44   :  { %v4640_v6 = vld [vmem:[%s6516_s2 + $0x180] ss:$8 sps:$4 sm:$0xff]   ;;  %v5373_v13 = vld [vmem:[%s6533_s23 + $0x30] ss:$8 sps:$4 sm:$0xff]   ;;  %v4645_v17 = vld [vmem:[%s6516_s2 + $0x174] ss:$8 sps:$4 sm:$0xff]  }
  0x45   :  { %v4634_v14 = vld [vmem:[%s6515_s1 + $0x10] sm:$0xff]   ;;  %v4635_v15 = vld [vmem:[%s6515_s1 + $0x18] sm:$0xff]   ;;  %v5444_v16 = vld [vmem:[%s6533_s23] ss:$8 sps:$4 sm:$0xff]   ;;  %vm3221_vm4 = vcmask 523264   ;;  %vm3578_vm5 = vcmask 517120  }
  0x46   :  { %v4643_v18 = vld [vmem:[%s6516_s2 + $0x170] ss:$8 sps:$4 sm:$0xff]   ;;  %v4648_v19 = vld [vmem:[%s6516_s2 + $0x164] ss:$8 sps:$4 sm:$0xff]   ;;  %v4646_v20 = vld [vmem:[%s6516_s2 + $0x160] ss:$8 sps:$4 sm:$0xff]  }
  0x47   :  { %v4649_v21 = vld [vmem:[%s6516_s2 + $0x150] ss:$8 sps:$4 sm:$0xff]   ;;  %v4651_v22 = vld [vmem:[%s6516_s2 + $0x154] ss:$8 sps:$4 sm:$0xff]   ;;  %v4654_v23 = vld [vmem:[%s6516_s2 + $0x144] ss:$8 sps:$4 sm:$0xff]  }
  0x48   :  { %v4652_v24 = vld [vmem:[%s6516_s2 + $0x140] ss:$8 sps:$4 sm:$0xff]   ;;  %v4657_v25 = vld [vmem:[%s6516_s2 + $0x134] ss:$8 sps:$4 sm:$0xff]   ;;  %v4655_v26 = vld [vmem:[%s6516_s2 + $0x130] ss:$8 sps:$4 sm:$0xff]  }
  0x49   :  { %v4660_v27 = vld [vmem:[%s6516_s2 + $0x124] ss:$8 sps:$4 sm:$0xff]   ;;  %v4658_v28 = vld [vmem:[%s6516_s2 + $0x120] ss:$8 sps:$4 sm:$0xff]   ;;  %v4670_v32 = vld [vmem:[%s6516_s2 + $0x2b0] ss:$8 sps:$4 sm:$0xff]  }
  0x4a   :  { %v4663_v29 = vld [vmem:[%s6516_s2 + $0x1a4] ss:$8 sps:$4 sm:$0xff]   ;;  %v4661_v30 = vld [vmem:[%s6516_s2 + $0x1a0] ss:$8 sps:$4 sm:$0xff]   ;;  %v4672_v33 = vld [vmem:[%s6516_s2 + $0x2b4] ss:$8 sps:$4 sm:$0xff]  }
  0x4b   :  { %v4666_v31 = vld [vmem:[%s6516_s2 + $0x224] ss:$8 sps:$4 sm:$0xff]   ;;  %v4676_v34 = vld [vmem:[%s6516_s2 + $0x2a0] ss:$8 sps:$4 sm:$0xff]   ;;  %v4682_v36 = vld [vmem:[%s6516_s2 + $0x290] ss:$8 sps:$4 sm:$0xff]  }
  0x4c   :  { %v4678_v35 = vld [vmem:[%s6516_s2 + $0x2a4] ss:$8 sps:$4 sm:$0xff]   ;;  %v4684_v37 = vld [vmem:[%s6516_s2 + $0x294] ss:$8 sps:$4 sm:$0xff]   ;;  %v4688_v38 = vld [vmem:[%s6516_s2 + $0x280] ss:$8 sps:$4 sm:$0xff]  }
  0x4d   :  { %v4690_v39 = vld [vmem:[%s6516_s2 + $0x284] ss:$8 sps:$4 sm:$0xff]   ;;  %v4694_v40 = vld [vmem:[%s6516_s2 + $0x270] ss:$8 sps:$4 sm:$0xff]   ;;  %v4696_v41 = vld [vmem:[%s6516_s2 + $0x274] ss:$8 sps:$4 sm:$0xff]  }
  0x4e   :  { %v4700_v42 = vld [vmem:[%s6516_s2 + $0x260] ss:$8 sps:$4 sm:$0xff]   ;;  %v4702_v43 = vld [vmem:[%s6516_s2 + $0x264] ss:$8 sps:$4 sm:$0xff]   ;;  %v4706_v44 = vld [vmem:[%s6516_s2 + $0x250] ss:$8 sps:$4 sm:$0xff]  }
  0x4f   :  { %v4708_v45 = vld [vmem:[%s6516_s2 + $0x254] ss:$8 sps:$4 sm:$0xff]   ;;  %v4712_v46 = vld [vmem:[%s6516_s2 + $0x240] ss:$8 sps:$4 sm:$0xff]   ;;  %v4714_v47 = vld [vmem:[%s6516_s2 + $0x244] ss:$8 sps:$4 sm:$0xff]  }
  0x50   :  { %v4717_v48 = vld [vmem:[%s6516_s2 + $0x2c4] ss:$8 sps:$4 sm:$0xff]   ;;  %v4715_v49 = vld [vmem:[%s6516_s2 + $0x2c0] ss:$8 sps:$4 sm:$0xff]   ;;  %vm5078_vm6 = vmmov 0   ;;  %vm3819_vm7 = vcmask 41984  }
  0x51   :  { %s5080_s29 = smov [#allocation2]  }
  0xdf   :  { %v161_v52 = vpop.f32.mrf.mxu0  ;;  %v235_v53 = vpop.f32.mrf.mxu1 }
  0xe1   :  { %v163_v54 = vpop.f32.mrf.mxu0  ;;  %v237_v55 = vpop.f32.mrf.mxu1 }
  0xe3   :  { %v165_v56 = vpop.f32.mrf.mxu0  ;;  %v239_v57 = vpop.f32.mrf.mxu1 }
  0xe4   :  { %v170_v58 = vpack.c.bf16 %v165_v56, %v161_v52  ;;  %v244_v63 = vpack.c.bf16 %v239_v57, %v235_v53 }
  0xe5   :  { %v167_v59 = vpop.f32.mrf.mxu0  ;;  %v241_v60 = vpop.f32.mrf.mxu1 }
  0xe6   :  { %v171_v61 = vpack.c.bf16 %v167_v59, %v163_v54  ;;  %v245_v62 = vpack.c.bf16 %v241_v60, %v237_v55 }
  0xe8   :  { %3895 = vmatprep.mubr.msk.bf16.mxu0 %vm355_vm2, %v245_v62  ;;  %3914 = vmatprep.mubr.msk.bf16.mxu1 %vm355_vm2, %v171_v61 }
  0xe9   :  { %392 = vmatmul.mubr.bf16.vlgmr.msra.gmra.mxu0 %v244_v63  ;;  %528 = vmatmul.mubr.bf16.vlgmr.msra.gmra.mxu1 %v170_v58 }
  0xea   :  { %556 = vmatpush1.bf16.msra.mxu0 %v5181_v5  ;;  %581 = vmatprep.mubr.bf16.mxu0 %v5076_v4 }
  0xeb   :  { %557 = vmatprep.subr.bf16.mxu0 %v5364_v3  ;;  %707 = vmatpush1.bf16.msra.mxu1 %v4637_v0 }
  0xec   :  { %708 = vmatprep.subr.bf16.mxu1 %v4642_v2  ;;  %v4664_v2 = vld [vmem:[%s6516_s2 + $0x220] ss:$8 sps:$4 sm:$0xff]  }
  0xee   :  { %558 = vmatpush1.bf16.msra.mxu0 %v5373_v13 }
  0xef   :  { %559 = vmatprep.subr.bf16.mxu0 %v5191_v7  ;;  %709 = vmatpush1.bf16.msra.mxu1 %v4640_v6  ;;  %v5395_v7 = vld [vmem:[%s6533_s23 + $0x24] ss:$8 sps:$4 sm:$0xff]  }
  0xf0   :  { %710 = vmatprep.subr.bf16.mxu1 %v4645_v17  ;;  %v4673_v17 = vld [vmem:[%s6516_s2 + $0x200] ss:$8 sps:$4 sm:$0xff]  }
  0xf2   :  { %560 = vmatpush1.bf16.msra.mxu0 %v5196_v8  ;;  %v5401_v8 = vld [vmem:[%s6533_s23 + $0x20] ss:$8 sps:$4 sm:$0xff]  }
  0xf3   :  { %561 = vmatprep.subr.bf16.mxu0 %v5203_v9  ;;  %v5407_v9 = vld [vmem:[%s6533_s23 + $0x14] ss:$8 sps:$4 sm:$0xff]   ;;  %711 = vmatpush1.bf16.msra.mxu1 %v4643_v18 }
  0xf4   :  { %712 = vmatprep.subr.bf16.mxu1 %v4648_v19  ;;  %v4681_v18 = vld [vmem:[%s6516_s2 + $0x1f4] ss:$8 sps:$4 sm:$0xff]   ;;  %v4679_v19 = vld [vmem:[%s6516_s2 + $0x1f0] ss:$8 sps:$4 sm:$0xff]  }
  0xf6   :  { %562 = vmatpush1.bf16.msra.mxu0 %v5210_v10 }
  0xf7   :  { %563 = vmatprep.subr.bf16.mxu0 %v5217_v11  ;;  %713 = vmatpush1.bf16.msra.mxu1 %v4646_v20  ;;  %v4687_v20 = vld [vmem:[%s6516_s2 + $0x1e4] ss:$8 sps:$4 sm:$0xff]  }
  0xf8   :  { %714 = vmatprep.subr.bf16.mxu1 %v4651_v22 }
  0xfa   :  { %564 = vmatpush1.bf16.msra.mxu0 %v5224_v12 }
  0xfb   :  { %3960 = vmatprep.subr.msk.bf16.mxu0 %vm120_vm0, %v5169_v1  ;;  %715 = vmatpush1.bf16.msra.mxu1 %v4649_v21 }
  0xfc   :  { %716 = vmatprep.subr.bf16.mxu1 %v4654_v23  ;;  %v4685_v23 = vld [vmem:[%s6516_s2 + $0x1e0] ss:$8 sps:$4 sm:$0xff]  }
  0xfd   :  { %3919 = vmatmul.mubr.msk.bf16.vlgmr.msra.gmra.mxu0 %vm116_vm1, %v4634_v14  ;;  %v4669_v14 = vld [vmem:[%s6516_s2 + $0x214] ss:$8 sps:$4 sm:$0xff]  }
  0xfe   :  { %771 = vmatpush1.bf16.msra.mxu0 %v5181_v5  ;;  %796 = vmatprep.mubr.bf16.mxu0 %v5076_v4 }
  0xff   :  { %772 = vmatprep.subr.bf16.mxu0 %v5364_v3  ;;  %717 = vmatpush1.bf16.msra.mxu1 %v4652_v24  ;;  %v4693_v24 = vld [vmem:[%s6516_s2 + $0x1d4] ss:$8 sps:$4 sm:$0xff]  }
 0x100   :  { %718 = vmatprep.subr.bf16.mxu1 %v4657_v25 }
 0x102   :  { %773 = vmatpush1.bf16.msra.mxu0 %v5373_v13 }
 0x103   :  { %774 = vmatprep.subr.bf16.mxu0 %v5395_v7  ;;  %719 = vmatpush1.bf16.msra.mxu1 %v4655_v26 }
 0x104   :  { %720 = vmatprep.subr.bf16.mxu1 %v4660_v27  ;;  %v4691_v27 = vld [vmem:[%s6516_s2 + $0x1d0] ss:$8 sps:$4 sm:$0xff]  }
 0x106   :  { %775 = vmatpush1.bf16.msra.mxu0 %v5401_v8 }
 0x107   :  { %776 = vmatprep.subr.bf16.mxu0 %v5407_v9  ;;  %721 = vmatpush1.bf16.msra.mxu1 %v4658_v28 }
 0x108   :  { %736 = vmatprep.subr.bf16.mxu1 %v4663_v29  ;;  %v4699_v29 = vld [vmem:[%s6516_s2 + $0x1c4] ss:$8 sps:$4 sm:$0xff]  }
 0x10a   :  { %777 = vmatpush1.bf16.msra.mxu0 %v5210_v10  ;;  %v5429_v10 = vld [vmem:[%s6533_s23 + $0x10] ss:$8 sps:$4 sm:$0xff]  }
 0x10b   :  { %778 = vmatprep.subr.bf16.mxu0 %v5217_v11  ;;  %v5435_v11 = vld [vmem:[%s6533_s23 + $0x4] ss:$8 sps:$4 sm:$0xff]   ;;  %737 = vmatpush2.bf16.msra.mxu1 %v4661_v30  ;;  %v4697_v30 = vld [vmem:[%s6516_s2 + $0x1c0] ss:$8 sps:$4 sm:$0xff]  }
 0x10c   :  { %921 = vmatprep.subr.bf16.mxu1 %v4666_v31  ;;  %v4705_v31 = vld [vmem:[%s6516_s2 + $0x1b4] ss:$8 sps:$4 sm:$0xff]  }
 0x10e   :  { %779 = vmatpush1.bf16.msra.mxu0 %v5224_v12  ;;  %v4636_v12 = vld [vmem:[%s6515_s1 + $0x20] sm:$0xff]  }
 0x10f   :  { %4002 = vmatprep.subr.msk.bf16.mxu0 %vm120_vm0, %v5169_v1 }
 0x111   :  { %3961 = vmatmul.mubr.msk.bf16.vlgmr.msra.gmra.mxu0 %vm116_vm1, %v4635_v15  ;;  %v4667_v15 = vld [vmem:[%s6516_s2 + $0x210] ss:$8 sps:$4 sm:$0xff]  }
 0x112   :  { %986 = vmatpush1.bf16.msra.mxu0 %v5181_v5  ;;  %1011 = vmatprep.mubr.bf16.mxu0 %v5076_v4 }
 0x113   :  { %987 = vmatprep.subr.bf16.mxu0 %v5364_v3 }
 0x116   :  { %988 = vmatpush1.bf16.msra.mxu0 %v5373_v13 }
 0x117   :  { %989 = vmatprep.subr.bf16.mxu0 %v5395_v7 }
 0x11a   :  { %990 = vmatpush1.bf16.msra.mxu0 %v5401_v8 }
 0x11b   :  { %991 = vmatprep.subr.bf16.mxu0 %v5407_v9 }
 0x11e   :  { %992 = vmatpush1.bf16.msra.mxu0 %v5429_v10 }
 0x11f   :  { %993 = vmatprep.subr.bf16.mxu0 %v5435_v11 }
 0x122   :  { %994 = vmatpush1.bf16.msra.mxu0 %v5444_v16 }
 0x123   :  { %1136 = vmatprep.subr.bf16.mxu0 %v4672_v33  ;;  %v4711_v33 = vld [vmem:[%s6516_s2 + $0x234] ss:$8 sps:$4 sm:$0xff]  }
 0x125   :  { %4003 = vmatmul.mubr.msk.bf16.vlgmr.msra.gmra.mxu0 %vm116_vm1, %v4636_v12  ;;  %v4675_v12 = vld [vmem:[%s6516_s2 + $0x204] ss:$8 sps:$4 sm:$0xff]  }
 0x126   :  { %1137 = vmatpush1.bf16.msra.mxu0 %v4670_v32  ;;  %v4703_v32 = vld [vmem:[%s6516_s2 + $0x1b0] ss:$8 sps:$4 sm:$0xff]  }
 0x127   :  { %1138 = vmatprep.subr.bf16.mxu0 %v4678_v35 }
 0x12a   :  { %1139 = vmatpush1.bf16.msra.mxu0 %v4676_v34  ;;  %v4709_v34 = vld [vmem:[%s6516_s2 + $0x230] ss:$8 sps:$4 sm:$0xff]  }
 0x12b   :  { %1140 = vmatprep.subr.bf16.mxu0 %v4684_v37 }
 0x12e   :  { %1141 = vmatpush1.bf16.msra.mxu0 %v4682_v36 }
 0x12f   :  { %1142 = vmatprep.subr.bf16.mxu0 %v4690_v39 }
 0x132   :  { %1143 = vmatpush1.bf16.msra.mxu0 %v4688_v38 }
 0x133   :  { %1144 = vmatprep.subr.bf16.mxu0 %v4696_v41 }
 0x136   :  { %1145 = vmatpush1.bf16.msra.mxu0 %v4694_v40 }
 0x137   :  { %1146 = vmatprep.subr.bf16.mxu0 %v4702_v43  ;;  %v4719_v43 = vld [vmem:[%s6515_s1 + $0x30] sm:$0xff]  }
 0x13a   :  { %1147 = vmatpush1.bf16.msra.mxu0 %v4700_v42  ;;  %v4718_v42 = vld [vmem:[%s6515_s1 + $0x28] sm:$0xff]  }
 0x13b   :  { %1148 = vmatprep.subr.bf16.mxu0 %v4708_v45  ;;  %v4722_v45 = vld [vmem:[%s6516_s2 + $0x344] ss:$8 sps:$4 sm:$0xff]  }
 0x13e   :  { %1149 = vmatpush1.bf16.msra.mxu0 %v4706_v44  ;;  %v4720_v44 = vld [vmem:[%s6516_s2 + $0x340] ss:$8 sps:$4 sm:$0xff]  }
 0x13f   :  { %1150 = vmatprep.subr.bf16.mxu0 %v4714_v47  ;;  %v4726_v47 = vld [vmem:[%s6516_s2 + $0x3d0] ss:$8 sps:$4 sm:$0xff]  }
 0x142   :  { %1151 = vmatpush1.bf16.msra.mxu0 %v4712_v46  ;;  %v4725_v46 = vld [vmem:[%s6516_s2 + $0x334] ss:$8 sps:$4 sm:$0xff]  }
 0x143   :  { %1166 = vmatprep.subr.bf16.mxu0 %v4717_v48  ;;  %v4728_v48 = vld [vmem:[%s6516_s2 + $0x3d4] ss:$8 sps:$4 sm:$0xff]  }
 0x146   :  { %1167 = vmatpush2.bf16.msra.mxu0 %v4715_v49  ;;  %v4723_v49 = vld [vmem:[%s6516_s2 + $0x330] ss:$8 sps:$4 sm:$0xff]  }
 0x147   :  { %4086 = vmatprep.subr.msk.bf16.mxu0 %vm120_vm0, %v5169_v1 }
 0x1a9   :  { %v393_v50 = vpop.f32.mrf.mxu0  ;;  %v529_v51 = vpop.f32.mrf.mxu1 }
 0x1aa   :  { %v5549_v52 = vadd.f32 %v529_v51, %v393_v50  ;;  %v4731_v50 = vld [vmem:[%s6516_s2 + $0x324] ss:$8 sps:$4 sm:$0xff]   ;;  %v4729_v51 = vld [vmem:[%s6516_s2 + $0x320] ss:$8 sps:$4 sm:$0xff]  }
 0x1ab   :  { %v395_v53 = vpop.f32.mrf.mxu0  ;;  %v531_v54 = vpop.f32.mrf.mxu1 }
 0x1ac   :  { %v5551_v55 = vadd.f32 %v531_v54, %v395_v53  ;;  %v4734_v53 = vld [vmem:[%s6516_s2 + $0x3c4] ss:$8 sps:$4 sm:$0xff]   ;;  %v4732_v54 = vld [vmem:[%s6516_s2 + $0x3c0] ss:$8 sps:$4 sm:$0xff]  }
 0x1ad   :  { %v397_v56 = vpop.f32.mrf.mxu0  ;;  %v533_v57 = vpop.f32.mrf.mxu1 }
 0x1ae   :  { %v5553_v58 = vadd.f32 %v533_v57, %v397_v56  ;;  %v4737_v56 = vld [vmem:[%s6516_s2 + $0x314] ss:$8 sps:$4 sm:$0xff]   ;;  %v4735_v57 = vld [vmem:[%s6516_s2 + $0x310] ss:$8 sps:$4 sm:$0xff]  }
 0x1af   :  { %v5555_v59 = vpop.f32.mrf.mxu0 }
 0x1bd   :  { %v583_v60 = vpop.f32.mrf.mxu0 }
 0x1bf   :  { %v585_v61 = vpop.f32.mrf.mxu0 }
 0x1c1   :  { %v587_v62 = vpop.f32.mrf.mxu0 }
 0x1c2   :  { %v592_v6 = vpack.c.bf16 %v587_v62, %v583_v60  ;;  %v4740_v60 = vld [vmem:[%s6516_s2 + $0x3b4] ss:$8 sps:$4 sm:$0xff]   ;;  %v4743_v62 = vld [vmem:[%s6516_s2 + $0x304] ss:$8 sps:$4 sm:$0xff]  }
 0x1c3   :  { %v589_v63 = vpop.f32.mrf.mxu0 }
 0x1c4   :  { %v593_v0 = vpack.c.bf16 %v589_v63, %v585_v61  ;;  %v4738_v61 = vld [vmem:[%s6516_s2 + $0x3b0] ss:$8 sps:$4 sm:$0xff]   ;;  %v4741_v63 = vld [vmem:[%s6516_s2 + $0x300] ss:$8 sps:$4 sm:$0xff]  }
 0x1c6   :  { %3956 = vmatprep.mubr.msk.bf16.mxu1 %vm355_vm2, %v593_v0  ;;  %v4746_v0 = vld [vmem:[%s6516_s2 + $0x3a4] ss:$8 sps:$4 sm:$0xff]  }
 0x1c7   :  { %739 = vmatmul.mubr.bf16.vlgmr.msra.gmra.mxu1 %v592_v6  ;;  %v4747_v6 = vld [vmem:[%s6516_s2 + $0x2f0] ss:$8 sps:$4 sm:$0xff]  }
 0x1c8   :  { %922 = vmatpush1.bf16.msra.mxu1 %v4664_v2  ;;  %v4744_v2 = vld [vmem:[%s6516_s2 + $0x3a0] ss:$8 sps:$4 sm:$0xff]  }
 0x1c9   :  { %923 = vmatprep.subr.bf16.mxu1 %v4669_v14  ;;  %v4749_v14 = vld [vmem:[%s6516_s2 + $0x2f4] ss:$8 sps:$4 sm:$0xff]  }
 0x1cc   :  { %924 = vmatpush1.bf16.msra.mxu1 %v4667_v15  ;;  %v4750_v15 = vld [vmem:[%s6516_s2 + $0x390] ss:$8 sps:$4 sm:$0xff]  }
 0x1cd   :  { %925 = vmatprep.subr.bf16.mxu1 %v4675_v12  ;;  %v4752_v12 = vld [vmem:[%s6516_s2 + $0x394] ss:$8 sps:$4 sm:$0xff]  }
 0x1d0   :  { %926 = vmatpush1.bf16.msra.mxu1 %v4673_v17  ;;  %v4755_v17 = vld [vmem:[%s6516_s2 + $0x2e4] ss:$8 sps:$4 sm:$0xff]  }
 0x1d1   :  { %927 = vmatprep.subr.bf16.mxu1 %v4681_v18  ;;  %v798_v21 = vpop.f32.mrf.mxu0  ;;  %v4758_v18 = vld [vmem:[%s6516_s2 + $0x384] ss:$8 sps:$4 sm:$0xff]  }
 0x1d3   :  { %v800_v22 = vpop.f32.mrf.mxu0 }
 0x1d4   :  { %928 = vmatpush1.bf16.msra.mxu1 %v4679_v19  ;;  %v4753_v19 = vld [vmem:[%s6516_s2 + $0x2e0] ss:$8 sps:$4 sm:$0xff]  }
 0x1d5   :  { %929 = vmatprep.subr.bf16.mxu1 %v4687_v20  ;;  %v802_v25 = vpop.f32.mrf.mxu0  ;;  %v4756_v20 = vld [vmem:[%s6516_s2 + $0x380] ss:$8 sps:$4 sm:$0xff]  }
 0x1d6   :  { %v807_v37 = vpack.c.bf16 %v802_v25, %v798_v21  ;;  %v4761_v21 = vld [vmem:[%s6516_s2 + $0x2d4] ss:$8 sps:$4 sm:$0xff]  }
 0x1d7   :  { %v804_v26 = vpop.f32.mrf.mxu0  ;;  %v4767_v25 = vld [vmem:[%s6516_s2 + $0x354] ss:$8 sps:$4 sm:$0xff]  }
 0x1d8   :  { %930 = vmatpush1.bf16.msra.mxu1 %v4685_v23  ;;  %v808_v28 = vpack.c.bf16 %v804_v26, %v800_v22  ;;  %v4759_v22 = vld [vmem:[%s6516_s2 + $0x2d0] ss:$8 sps:$4 sm:$0xff]   ;;  %v4764_v23 = vld [vmem:[%s6516_s2 + $0x374] ss:$8 sps:$4 sm:$0xff]  }
 0x1d9   :  { %931 = vmatprep.subr.bf16.mxu1 %v4693_v24  ;;  %v4762_v24 = vld [vmem:[%s6516_s2 + $0x370] ss:$8 sps:$4 sm:$0xff]  }
 0x1da   :  { %3998 = vmatprep.mubr.msk.bf16.mxu1 %vm355_vm2, %v808_v28  ;;  %v4765_v26 = vld [vmem:[%s6516_s2 + $0x350] ss:$8 sps:$4 sm:$0xff]   ;;  %v4768_v28 = vld [vmem:[%s6516_s2 + $0x360] ss:$8 sps:$4 sm:$0xff]  }
 0x1dc   :  { %932 = vmatpush1.bf16.msra.mxu1 %v4691_v27  ;;  %v4770_v27 = vld [vmem:[%s6516_s2 + $0x364] ss:$8 sps:$4 sm:$0xff]  }
 0x1dd   :  { %933 = vmatprep.subr.bf16.mxu1 %v4699_v29  ;;  %v4773_v29 = vld [vmem:[%s6516_s2 + $0x3e4] ss:$8 sps:$4 sm:$0xff]  }
 0x1e0   :  { %934 = vmatpush1.bf16.msra.mxu1 %v4697_v30  ;;  %v4771_v30 = vld [vmem:[%s6516_s2 + $0x3e0] ss:$8 sps:$4 sm:$0xff]  }
 0x1e1   :  { %935 = vmatprep.subr.bf16.mxu1 %v4705_v31  ;;  %v535_v31 = vpop.f32.mrf.mxu1 }
 0x1e4   :  { %936 = vmatpush1.bf16.msra.mxu1 %v4703_v32 }
 0x1e5   :  { %v1013_v35 = vpop.f32.mrf.mxu0  ;;  %951 = vmatprep.subr.bf16.mxu1 %v4711_v33 }
 0x1e7   :  { %v1015_v36 = vpop.f32.mrf.mxu0 }
 0x1e8   :  { %952 = vmatpush2.bf16.msra.mxu1 %v4709_v34 }
 0x1e9   :  { %v1017_v38 = vpop.f32.mrf.mxu0  ;;  %4044 = vmatprep.subr.msk.bf16.mxu1 %vm120_vm0, %v5169_v1 }
 0x1ea   :  { %v1022_v39 = vpack.c.bf16 %v1017_v38, %v1013_v35 }
 0x1eb   :  { %954 = vmatmul.mubr.bf16.vlgmr.msra.gmra.mxu1 %v807_v37  ;;  %v1019_v40 = vpop.f32.mrf.mxu0 }
 0x1ec   :  { %v1023_v41 = vpack.c.bf16 %v1019_v40, %v1015_v36  ;;  %1201 = vmatpush1.bf16.msra.mxu1 %v5181_v5  ;;  %1226 = vmatprep.mubr.bf16.mxu1 %v5076_v4 }
 0x1ed   :  { %1202 = vmatprep.subr.bf16.mxu1 %v5364_v3 }
 0x1ee   :  { %4040 = vmatprep.mubr.msk.bf16.mxu0 %vm355_vm2, %v1023_v41 }
 0x1ef   :  { %1169 = vmatmul.mubr.bf16.vlgmr.msra.gmra.mxu0 %v1022_v39 }
 0x1f0   :  { %1203 = vmatpush1.bf16.msra.mxu1 %v5373_v13  ;;  %1416 = vmatpush1.bf16.msra.mxu0 %v5181_v5 }
 0x1f1   :  { %1204 = vmatprep.subr.bf16.mxu1 %v5395_v7  ;;  %1417 = vmatprep.subr.bf16.mxu0 %v5364_v3 }
 0x1f2   :  { %1441 = vmatprep.mubr.bf16.mxu0 %v5076_v4 }
 0x1f4   :  { %1205 = vmatpush1.bf16.msra.mxu1 %v5401_v8  ;;  %1418 = vmatpush1.bf16.msra.mxu0 %v5373_v13 }
 0x1f5   :  { %1206 = vmatprep.subr.bf16.mxu1 %v5407_v9  ;;  %1419 = vmatprep.subr.bf16.mxu0 %v5395_v7 }
 0x1f8   :  { %1207 = vmatpush1.bf16.msra.mxu1 %v5429_v10  ;;  %1420 = vmatpush1.bf16.msra.mxu0 %v5401_v8 }
 0x1f9   :  { %1208 = vmatprep.subr.bf16.mxu1 %v5435_v11  ;;  %1421 = vmatprep.subr.bf16.mxu0 %v5407_v9 }
 0x1fc   :  { %1209 = vmatpush1.bf16.msra.mxu1 %v5444_v16  ;;  %1422 = vmatpush1.bf16.msra.mxu0 %v5429_v10 }
 0x1fd   :  { %1423 = vmatprep.subr.bf16.mxu0 %v5435_v11  ;;  %1351 = vmatprep.subr.bf16.mxu1 %v4722_v45 }
 0x1ff   :  { %4045 = vmatmul.mubr.msk.bf16.vlgmr.msra.gmra.mxu1 %vm116_vm1, %v4718_v42 }
 0x200   :  { %1424 = vmatpush1.bf16.msra.mxu0 %v5444_v16  ;;  %1352 = vmatpush1.bf16.msra.mxu1 %v4720_v44 }
 0x201   :  { %1566 = vmatprep.subr.bf16.mxu0 %v4728_v48  ;;  %1353 = vmatprep.subr.bf16.mxu1 %v4725_v46 }
 0x203   :  { %4087 = vmatmul.mubr.msk.bf16.vlgmr.msra.gmra.mxu0 %vm116_vm1, %v4719_v43 }
 0x204   :  { %1567 = vmatpush1.bf16.msra.mxu0 %v4726_v47  ;;  %1354 = vmatpush1.bf16.msra.mxu1 %v4723_v49 }
 0x205   :  { %1355 = vmatprep.subr.bf16.mxu1 %v4731_v50  ;;  %1568 = vmatprep.subr.bf16.mxu0 %v4734_v53 }
 0x208   :  { %1356 = vmatpush1.bf16.msra.mxu1 %v4729_v51  ;;  %1569 = vmatpush1.bf16.msra.mxu0 %v4732_v54 }
 0x209   :  { %1357 = vmatprep.subr.bf16.mxu1 %v4737_v56  ;;  %1570 = vmatprep.subr.bf16.mxu0 %v4740_v60 }
 0x20c   :  { %1358 = vmatpush1.bf16.msra.mxu1 %v4735_v57  ;;  %1571 = vmatpush1.bf16.msra.mxu0 %v4738_v61 }
 0x20d   :  { %1359 = vmatprep.subr.bf16.mxu1 %v4743_v62  ;;  %1572 = vmatprep.subr.bf16.mxu0 %v4746_v0 }
 0x210   :  { %1360 = vmatpush1.bf16.msra.mxu1 %v4741_v63  ;;  %1573 = vmatpush1.bf16.msra.mxu0 %v4744_v2 }
 0x211   :  { %1361 = vmatprep.subr.bf16.mxu1 %v4749_v14  ;;  %1574 = vmatprep.subr.bf16.mxu0 %v4752_v12  ;;  %v4787_v12 = vld [vmem:[%s6516_s2 + $0x420] ss:$8 sps:$4 sm:$0xff]  }
 0x214   :  { %1362 = vmatpush1.bf16.msra.mxu1 %v4747_v6  ;;  %1575 = vmatpush1.bf16.msra.mxu0 %v4750_v15  ;;  %v4789_v15 = vld [vmem:[%s6516_s2 + $0x424] ss:$8 sps:$4 sm:$0xff]  }
 0x215   :  { %1363 = vmatprep.subr.bf16.mxu1 %v4755_v17  ;;  %1576 = vmatprep.subr.bf16.mxu0 %v4758_v18  ;;  %v4790_v17 = vld [vmem:[%s6516_s2 + $0x410] ss:$8 sps:$4 sm:$0xff]   ;;  %v4792_v18 = vld [vmem:[%s6516_s2 + $0x414] ss:$8 sps:$4 sm:$0xff]  }
 0x218   :  { %1364 = vmatpush1.bf16.msra.mxu1 %v4753_v19  ;;  %1577 = vmatpush1.bf16.msra.mxu0 %v4756_v20  ;;  %v4795_v19 = vld [vmem:[%s6516_s2 + $0x404] ss:$8 sps:$4 sm:$0xff]   ;;  %v4793_v20 = vld [vmem:[%s6516_s2 + $0x400] ss:$8 sps:$4 sm:$0xff]  }
 0x219   :  { %1365 = vmatprep.subr.bf16.mxu1 %v4761_v21  ;;  %1578 = vmatprep.subr.bf16.mxu0 %v4764_v23  ;;  %v4798_v21 = vld [vmem:[%s6516_s2 + $0x3f4] ss:$8 sps:$4 sm:$0xff]  }
 0x21a   :  { %v4801_v23 = vld [vmem:[%s6516_s2 + $0x474] ss:$8 sps:$4 sm:$0xff]  }
 0x21c   :  { %1366 = vmatpush1.bf16.msra.mxu1 %v4759_v22  ;;  %1579 = vmatpush1.bf16.msra.mxu0 %v4762_v24  ;;  %v4796_v22 = vld [vmem:[%s6516_s2 + $0x3f0] ss:$8 sps:$4 sm:$0xff]  }
 0x21d   :  { %1381 = vmatprep.subr.bf16.mxu1 %v4767_v25  ;;  %1580 = vmatprep.subr.bf16.mxu0 %v4770_v27  ;;  %v4799_v24 = vld [vmem:[%s6516_s2 + $0x470] ss:$8 sps:$4 sm:$0xff]   ;;  %v4804_v25 = vld [vmem:[%s6519_s5 + $0x74] ss:$8 sps:$4 sm:$0xff]  }
 0x220   :  { %1382 = vmatpush2.bf16.msra.mxu1 %v4765_v26  ;;  %1581 = vmatpush1.bf16.msra.mxu0 %v4768_v28 }
 0x221   :  { %4128 = vmatprep.subr.msk.bf16.mxu1 %vm120_vm0, %v5169_v1  ;;  %1596 = vmatprep.subr.bf16.mxu0 %v4773_v29  ;;  %v536_v1 = vadd.f32 %v535_v31, %v5555_v59 }
 0x224   :  { %1597 = vmatpush2.bf16.msra.mxu0 %v4771_v30 }
 0x287   :  { %v740_v32 = vpop.f32.mrf.mxu1 }
 0x288   :  { %v749_v33 = vadd.f32 %v740_v32, %v5549_v52 }
 0x289   :  { %v742_v34 = vpop.f32.mrf.mxu1 }
 0x28a   :  { %v750_v35 = vadd.f32 %v742_v34, %v5551_v55 }
 0x28b   :  { %v744_v36 = vpop.f32.mrf.mxu1 }
 0x28c   :  { %v751_v37 = vadd.f32 %v744_v36, %v5553_v58 }
 0x28d   :  { %v746_v38 = vpop.f32.mrf.mxu1 }
 0x28e   :  { %v752_v39 = vadd.f32 %v746_v38, %v536_v1  ;;  %v4802_v38 = vld [vmem:[%s6519_s5 + $0x70] ss:$8 sps:$4 sm:$0xff]  }
 0x2ab   :  { %v955_v40 = vpop.f32.mrf.mxu1 }
 0x2ac   :  { %v964_v41 = vadd.f32 %v955_v40, %v749_v33  ;;  %v4807_v40 = vld [vmem:[%s6519_s5 + $0x64] ss:$8 sps:$4 sm:$0xff]  }
 0x2ad   :  { %v957_v42 = vpop.f32.mrf.mxu1 }
 0x2ae   :  { %v965_v43 = vadd.f32 %v957_v42, %v750_v35  ;;  %v4810_v42 = vld [vmem:[%s6519_s5 + $0x54] ss:$8 sps:$4 sm:$0xff]  }
 0x2af   :  { %v959_v44 = vpop.f32.mrf.mxu1  ;;  %v1170_v45 = vpop.f32.mrf.mxu0 }
 0x2b0   :  { %v966_v46 = vadd.f32 %v959_v44, %v751_v37  ;;  %v5755_v47 = vadd.f32 %v1170_v45, %v964_v41  ;;  %v4805_v41 = vld [vmem:[%s6519_s5 + $0x60] ss:$8 sps:$4 sm:$0xff]   ;;  %v4813_v44 = vld [vmem:[%s6519_s5 + $0x44] ss:$8 sps:$4 sm:$0xff]  }
 0x2b1   :  { %v961_v52 = vpop.f32.mrf.mxu1  ;;  %v1172_v48 = vpop.f32.mrf.mxu0  ;;  %v4811_v45 = vld [vmem:[%s6519_s5 + $0x40] ss:$8 sps:$4 sm:$0xff]  }
 0x2b2   :  { %v967_v49 = vadd.f32 %v961_v52, %v752_v39  ;;  %v5757_v55 = vadd.f32 %v1172_v48, %v965_v43  ;;  %v4808_v43 = vld [vmem:[%s6519_s5 + $0x50] ss:$8 sps:$4 sm:$0xff]   ;;  %v4819_v52 = vld [vmem:[%s6519_s5 + $0x24] ss:$8 sps:$4 sm:$0xff]   ;;  %v4817_v48 = vld [vmem:[%s6519_s5 + $0x20] ss:$8 sps:$4 sm:$0xff]  }
 0x2b3   :  { %v1174_v50 = vpop.f32.mrf.mxu0 }
 0x2b4   :  { %v5759_v59 = vadd.f32 %v1174_v50, %v966_v46  ;;  %v4816_v46 = vld [vmem:[%s6519_s5 + $0x34] ss:$8 sps:$4 sm:$0xff]   ;;  %v4825_v50 = vld [vmem:[%s6519_s5 + $0x4] ss:$8 sps:$4 sm:$0xff]  }
 0x2b5   :  { %v1176_v58 = vpop.f32.mrf.mxu0 }
 0x2b6   :  { %v5761_v51 = vadd.f32 %v1176_v58, %v967_v49  ;;  %v4822_v49 = vld [vmem:[%s6519_s5 + $0x14] ss:$8 sps:$4 sm:$0xff]  }
 0x2b7   :  { %v4828_v58 = vld [vmem:[%s6519_s5 + $0xf4] ss:$8 sps:$4 sm:$0xff]  }
 0x2bf   :  { %v1228_v53 = vpop.f32.mrf.mxu1 }
 0x2c1   :  { %v1230_v54 = vpop.f32.mrf.mxu1 }
 0x2c3   :  { %v1232_v56 = vpop.f32.mrf.mxu1  ;;  %v1443_v57 = vpop.f32.mrf.mxu0 }
 0x2c4   :  { %v1237_v63 = vpack.c.bf16 %v1232_v56, %v1228_v53  ;;  %v4831_v53 = vld [vmem:[%s6519_s5 + $0xe4] ss:$8 sps:$4 sm:$0xff]   ;;  %v4834_v56 = vld [vmem:[%s6519_s5 + $0xd4] ss:$8 sps:$4 sm:$0xff]  }
 0x2c5   :  { %v1234_v60 = vpop.f32.mrf.mxu1  ;;  %v1445_v61 = vpop.f32.mrf.mxu0 }
 0x2c6   :  { %v1238_v62 = vpack.c.bf16 %v1234_v60, %v1230_v54  ;;  %v4829_v54 = vld [vmem:[%s6519_s5 + $0xe0] ss:$8 sps:$4 sm:$0xff]   ;;  %v4837_v60 = vld [vmem:[%s6519_s5 + $0xc4] ss:$8 sps:$4 sm:$0xff]  }
 0x2c7   :  { %v1447_v0 = vpop.f32.mrf.mxu0 }
 0x2c8   :  { %4082 = vmatprep.mubr.msk.bf16.mxu1 %vm355_vm2, %v1238_v62  ;;  %v1452_v2 = vpack.c.bf16 %v1447_v0, %v1443_v57  ;;  %v4832_v57 = vld [vmem:[%s6519_s5 + $0xd0] ss:$8 sps:$4 sm:$0xff]   ;;  %v4840_v62 = vld [vmem:[%s6519_s5 + $0xb4] ss:$8 sps:$4 sm:$0xff]   ;;  %v4843_v0 = vld [vmem:[%s6519_s5 + $0xa4] ss:$8 sps:$4 sm:$0xff]  }
 0x2c9   :  { %1384 = vmatmul.mubr.bf16.vlgmr.msra.gmra.mxu1 %v1237_v63  ;;  %v1449_v6 = vpop.f32.mrf.mxu0  ;;  %v4838_v63 = vld [vmem:[%s6519_s5 + $0xb0] ss:$8 sps:$4 sm:$0xff]  }
 0x2ca   :  { %v1453_v14 = vpack.c.bf16 %v1449_v6, %v1445_v61  ;;  %1631 = vmatpush1.bf16.msra.mxu1 %v5181_v5  ;;  %1656 = vmatprep.mubr.bf16.mxu1 %v5076_v4  ;;  %v4777_v5 = vld [vmem:[%s6516_s2 + $0x464] ss:$8 sps:$4 sm:$0xff]   ;;  %v4835_v61 = vld [vmem:[%s6519_s5 + $0xc0] ss:$8 sps:$4 sm:$0xff]   ;;  %v4846_v6 = vld [vmem:[%s6519_s5 + $0x94] ss:$8 sps:$4 sm:$0xff]  }
 0x2cb   :  { %1632 = vmatprep.subr.bf16.mxu1 %v5364_v3  ;;  %v4774_v3 = vld [vmem:[%s6515_s1 + $0x38] sm:$0xff]  }
 0x2cc   :  { %4124 = vmatprep.mubr.msk.bf16.mxu0 %vm355_vm2, %v1453_v14  ;;  %v4844_v14 = vld [vmem:[%s6519_s5 + $0x90] ss:$8 sps:$4 sm:$0xff]  }
 0x2cd   :  { %1599 = vmatmul.mubr.bf16.vlgmr.msra.gmra.mxu0 %v1452_v2  ;;  %v4841_v2 = vld [vmem:[%s6519_s5 + $0xa0] ss:$8 sps:$4 sm:$0xff]  }
 0x2ce   :  { %1633 = vmatpush1.bf16.msra.mxu1 %v5373_v13  ;;  %1886 = vmatprep.mubr.bf16.mxu0 %v5076_v4  ;;  %v4775_v13 = vld [vmem:[%s6516_s2 + $0x460] ss:$8 sps:$4 sm:$0xff]  }
 0x2cf   :  { %1634 = vmatprep.subr.bf16.mxu1 %v5395_v7  ;;  %v4780_v7 = vld [vmem:[%s6516_s2 + $0x454] ss:$8 sps:$4 sm:$0xff]  }
 0x2d2   :  { %1635 = vmatpush1.bf16.msra.mxu1 %v5401_v8  ;;  %v4778_v8 = vld [vmem:[%s6516_s2 + $0x450] ss:$8 sps:$4 sm:$0xff]  }
 0x2d3   :  { %1636 = vmatprep.subr.bf16.mxu1 %v5407_v9  ;;  %v4783_v9 = vld [vmem:[%s6516_s2 + $0x444] ss:$8 sps:$4 sm:$0xff]  }
 0x2d6   :  { %1637 = vmatpush1.bf16.msra.mxu1 %v5429_v10  ;;  %v4781_v10 = vld [vmem:[%s6516_s2 + $0x440] ss:$8 sps:$4 sm:$0xff]  }
 0x2d7   :  { %1638 = vmatprep.subr.bf16.mxu1 %v5435_v11  ;;  %v4786_v11 = vld [vmem:[%s6516_s2 + $0x434] ss:$8 sps:$4 sm:$0xff]  }
 0x2da   :  { %1639 = vmatpush1.bf16.msra.mxu1 %v5444_v16  ;;  %v4784_v16 = vld [vmem:[%s6516_s2 + $0x430] ss:$8 sps:$4 sm:$0xff]  }
 0x2db   :  { %1781 = vmatprep.subr.bf16.mxu1 %v4777_v5  ;;  %v4849_v5 = vld [vmem:[%s6519_s5 + $0x84] ss:$8 sps:$4 sm:$0xff]  }
 0x2dd   :  { %4129 = vmatmul.mubr.msk.bf16.vlgmr.msra.gmra.mxu1 %vm116_vm1, %v4774_v3  ;;  %v4847_v3 = vld [vmem:[%s6519_s5 + $0x80] ss:$8 sps:$4 sm:$0xff]  }
 0x2de   :  { %1782 = vmatpush1.bf16.msra.mxu1 %v4775_v13  ;;  %v1830_v13 = vlaneseq }
 0x2df   :  { %1783 = vmatprep.subr.bf16.mxu1 %v4780_v7 }
 0x2e2   :  { %1784 = vmatpush1.bf16.msra.mxu1 %v4778_v8  ;;  %v5943_v8 = vshrl.u32 %v1830_v13, 7  ;;  %v4894_v13 = vld [vmem:[%s6519_s5 + $0x194] ss:$8 sps:$4 sm:$0xff]  }
 0x2e3   :  { %1785 = vmatprep.subr.bf16.mxu1 %v4783_v9 }
 0x2e6   :  { %1786 = vmatpush1.bf16.msra.mxu1 %v4781_v10  ;;  %v1832_v10 = vsub.s32 0, %v5943_v8 }
 0x2e7   :  { %1787 = vmatprep.subr.bf16.mxu1 %v4786_v11 }
 0x2ea   :  { %1788 = vmatpush1.bf16.msra.mxu1 %v4784_v16  ;;  %v1828_v16 = vld [vmem:[%s6517_s3] sm:$0x3] }
 0x2eb   :  { %1789 = vmatprep.subr.bf16.mxu1 %v4789_v15 }
 0x2ee   :  { %1790 = vmatpush1.bf16.msra.mxu1 %v4787_v12  ;;  %v1836_v12 = vsub.s32 1, %v5943_v8  ;;  %v2998_v8 = vld [vmem:[%s6521_s7] sm:$0x1] }
 0x2ef   :  { %1791 = vmatprep.subr.bf16.mxu1 %v4792_v18 }
 0x2f2   :  { %1792 = vmatpush1.bf16.msra.mxu1 %v4790_v17 }
 0x2f3   :  { %1793 = vmatprep.subr.bf16.mxu1 %v4795_v19 }
 0x2f6   :  { %1794 = vmatpush1.bf16.msra.mxu1 %v4793_v20  ;;  %v1833_v20 = vrot.slane %v1828_v16, %v1832_v10 }
 0x2f7   :  { %1795 = vmatprep.subr.bf16.mxu1 %v4798_v21 }
 0x2fa   :  { %1796 = vmatpush1.bf16.msra.mxu1 %v4796_v22 }
 0x2fb   :  { %1811 = vmatprep.subr.bf16.mxu1 %v4801_v23 }
 0x2fe   :  { %1812 = vmatpush2.bf16.msra.mxu1 %v4799_v24 }
 0x2ff   :  { %2371 = vmatprep.subr.bf16.mxu1 %v4804_v25  ;;  %v1837_v25 = vrot.slane %v1828_v16, %v1836_v12 }
 0x389   :  { %v1385_v26 = vpop.f32.mrf.mxu1 }
 0x38a   :  { %v5838_v27 = vadd.f32 %v1385_v26, %v5755_v47  ;;  %v4814_v47 = vld [vmem:[%s6519_s5 + $0x30] ss:$8 sps:$4 sm:$0xff]  }
 0x38b   :  { %v1387_v28 = vpop.f32.mrf.mxu1 }
 0x38c   :  { %v5841_v29 = vadd.f32 %v1387_v28, %v5757_v55  ;;  %v4820_v55 = vld [vmem:[%s6519_s5 + $0x10] ss:$8 sps:$4 sm:$0xff]  }
 0x38d   :  { %v1389_v30 = vpop.f32.mrf.mxu1  ;;  %v1600_v7 = vpop.f32.mrf.mxu0 }
 0x38e   :  { %v5844_v31 = vadd.f32 %v1389_v30, %v5759_v59  ;;  %v4823_v59 = vld [vmem:[%s6519_s5] ss:$8 sps:$4 sm:$0xff]   ;;  %v1609_v15 = vadd.f32 %v1600_v7, %v5838_v27  ;;  %v4892_v7 = vld [vmem:[%s6519_s5 + $0x190] ss:$8 sps:$4 sm:$0xff]  }
 0x38f   :  { %v1391_v32 = vpop.f32.mrf.mxu1  ;;  %v1602_v9 = vpop.f32.mrf.mxu0 }
 0x390   :  { %v5847_v33 = vadd.f32 %v1391_v32, %v5761_v51  ;;  %v4826_v51 = vld [vmem:[%s6519_s5 + $0xf0] ss:$8 sps:$4 sm:$0xff]   ;;  %v1610_v18 = vadd.f32 %v1602_v9, %v5841_v29  ;;  %v4897_v9 = vld [vmem:[%s6519_s5 + $0x184] ss:$8 sps:$4 sm:$0xff]  }
 0x391   :  { %v1604_v11 = vpop.f32.mrf.mxu0 }
 0x392   :  { %v1611_v23 = vadd.f32 %v1604_v11, %v5844_v31  ;;  %v4895_v11 = vld [vmem:[%s6519_s5 + $0x180] ss:$8 sps:$4 sm:$0xff]  }
 0x393   :  { %v1606_v21 = vpop.f32.mrf.mxu0 }
 0x394   :  { %v1612_v27 = vadd.f32 %v1606_v21, %v5847_v33  ;;  %v1850_v33 = vld [vmem:[%s6518_s4] sm:$0xf] }
 0x39d   :  { %v1658_v34 = vpop.f32.mrf.mxu1 }
 0x39f   :  { %v1660_v35 = vpop.f32.mrf.mxu1 }
 0x3a1   :  { %v1662_v36 = vpop.f32.mrf.mxu1 }
 0x3a2   :  { %v1667_v39 = vpack.c.bf16 %v1662_v36, %v1658_v34 }
 0x3a3   :  { %v1664_v1 = vpop.f32.mrf.mxu1 }
 0x3a4   :  { %v1668_v37 = vpack.c.bf16 %v1664_v1, %v1660_v35 }
 0x3a6   :  { %4166 = vmatprep.mubr.msk.bf16.mxu1 %vm355_vm2, %v1668_v37 }
 0x3a7   :  { %1814 = vmatmul.mubr.bf16.vlgmr.msra.gmra.mxu1 %v1667_v39 }
 0x3a8   :  { %2372 = vmatpush1.bf16.msra.mxu1 %v4802_v38 }
 0x3a9   :  { %2373 = vmatprep.subr.bf16.mxu1 %v4807_v40 }
 0x3ac   :  { %2374 = vmatpush1.bf16.msra.mxu1 %v4805_v41  ;;  %v4852_v41 = vld [vmem:[%s6519_s5 + $0x174] ss:$8 sps:$4 sm:$0xff]  }
 0x3ad   :  { %2375 = vmatprep.subr.bf16.mxu1 %v4810_v42  ;;  %v4850_v42 = vld [vmem:[%s6519_s5 + $0x170] ss:$8 sps:$4 sm:$0xff]  }
 0x3b0   :  { %2376 = vmatpush1.bf16.msra.mxu1 %v4808_v43  ;;  %v4168_v43 = vld [vmem:[%s6518_s4 + $0x4] sm:$0xf] }
 0x3b1   :  { %2377 = vmatprep.subr.bf16.mxu1 %v4813_v44  ;;  %v4855_v44 = vld [vmem:[%s6519_s5 + $0x164] ss:$8 sps:$4 sm:$0xff]  }
 0x3b4   :  { %2378 = vmatpush1.bf16.msra.mxu1 %v4811_v45  ;;  %v4853_v45 = vld [vmem:[%s6519_s5 + $0x160] ss:$8 sps:$4 sm:$0xff]  }
 0x3b5   :  { %2379 = vmatprep.subr.bf16.mxu1 %v4816_v46  ;;  %v4858_v46 = vld [vmem:[%s6519_s5 + $0x154] ss:$8 sps:$4 sm:$0xff]  }
 0x3b8   :  { %2380 = vmatpush1.bf16.msra.mxu1 %v4814_v47  ;;  %v4856_v47 = vld [vmem:[%s6519_s5 + $0x150] ss:$8 sps:$4 sm:$0xff]  }
 0x3b9   :  { %2381 = vmatprep.subr.bf16.mxu1 %v4819_v52  ;;  %v4861_v52 = vld [vmem:[%s6519_s5 + $0x144] ss:$8 sps:$4 sm:$0xff]  }
 0x3bc   :  { %2382 = vmatpush1.bf16.msra.mxu1 %v4817_v48  ;;  %v4859_v48 = vld [vmem:[%s6519_s5 + $0x140] ss:$8 sps:$4 sm:$0xff]  }
 0x3bd   :  { %2383 = vmatprep.subr.bf16.mxu1 %v4822_v49  ;;  %v4864_v49 = vld [vmem:[%s6519_s5 + $0x134] ss:$8 sps:$4 sm:$0xff]  }
 0x3c0   :  { %2384 = vmatpush1.bf16.msra.mxu1 %v4820_v55  ;;  %v4862_v55 = vld [vmem:[%s6519_s5 + $0x130] ss:$8 sps:$4 sm:$0xff]  }
 0x3c1   :  { %2385 = vmatprep.subr.bf16.mxu1 %v4825_v50  ;;  %v4867_v50 = vld [vmem:[%s6519_s5 + $0x124] ss:$8 sps:$4 sm:$0xff]  }
 0x3c4   :  { %2386 = vmatpush1.bf16.msra.mxu1 %v4823_v59  ;;  %v4865_v59 = vld [vmem:[%s6519_s5 + $0x120] ss:$8 sps:$4 sm:$0xff]  }
 0x3c5   :  { %2387 = vmatprep.subr.bf16.mxu1 %v4828_v58  ;;  %v4870_v58 = vld [vmem:[%s6519_s5 + $0x114] ss:$8 sps:$4 sm:$0xff]  }
 0x3c8   :  { %2388 = vmatpush2.bf16.msra.mxu1 %v4826_v51  ;;  %v4868_v51 = vld [vmem:[%s6519_s5 + $0x110] ss:$8 sps:$4 sm:$0xff]  }
 0x3c9   :  { %2389 = vmatprep.subr.bf16.mxu1 %v4831_v53  ;;  %v4873_v53 = vld [vmem:[%s6519_s5 + $0x104] ss:$8 sps:$4 sm:$0xff]  }
 0x3cc   :  { %2390 = vmatpush2.bf16.msra.mxu1 %v4829_v54  ;;  %v4871_v54 = vld [vmem:[%s6519_s5 + $0x100] ss:$8 sps:$4 sm:$0xff]  }
 0x3cd   :  { %2391 = vmatprep.subr.bf16.mxu1 %v4834_v56  ;;  %v4876_v56 = vld [vmem:[%s6519_s5 + $0x1f4] ss:$8 sps:$4 sm:$0xff]  }
 0x3d0   :  { %2392 = vmatpush2.bf16.msra.mxu1 %v4832_v57  ;;  %v4874_v57 = vld [vmem:[%s6519_s5 + $0x1f0] ss:$8 sps:$4 sm:$0xff]  }
 0x3d1   :  { %2393 = vmatprep.subr.bf16.mxu1 %v4837_v60  ;;  %v4879_v60 = vld [vmem:[%s6519_s5 + $0x1e4] ss:$8 sps:$4 sm:$0xff]  }
 0x3d4   :  { %2394 = vmatpush2.bf16.msra.mxu1 %v4835_v61  ;;  %v4877_v61 = vld [vmem:[%s6519_s5 + $0x1e0] ss:$8 sps:$4 sm:$0xff]  }
 0x3d5   :  { %2395 = vmatprep.subr.bf16.mxu1 %v4840_v62  ;;  %v4882_v62 = vld [vmem:[%s6519_s5 + $0x1d4] ss:$8 sps:$4 sm:$0xff]  }
 0x3d8   :  { %2396 = vmatpush2.bf16.msra.mxu1 %v4838_v63  ;;  %v4880_v63 = vld [vmem:[%s6519_s5 + $0x1d0] ss:$8 sps:$4 sm:$0xff]  }
 0x3d9   :  { %2397 = vmatprep.subr.bf16.mxu1 %v4843_v0  ;;  %v4885_v0 = vld [vmem:[%s6519_s5 + $0x1c4] ss:$8 sps:$4 sm:$0xff]  }
 0x3dc   :  { %2398 = vmatpush2.bf16.msra.mxu1 %v4841_v2  ;;  %v4883_v2 = vld [vmem:[%s6519_s5 + $0x1c0] ss:$8 sps:$4 sm:$0xff]  }
 0x3dd   :  { %2399 = vmatprep.subr.bf16.mxu1 %v4846_v6  ;;  %v4888_v6 = vld [vmem:[%s6519_s5 + $0x1b4] ss:$8 sps:$4 sm:$0xff]  }
 0x3e0   :  { %2400 = vmatpush2.bf16.msra.mxu1 %v4844_v14  ;;  %v4886_v14 = vld [vmem:[%s6519_s5 + $0x1b0] ss:$8 sps:$4 sm:$0xff]  }
 0x3e1   :  { %2401 = vmatprep.subr.bf16.mxu1 %v4849_v5  ;;  %v4891_v5 = vld [vmem:[%s6519_s5 + $0x1a4] ss:$8 sps:$4 sm:$0xff]  }
 0x3e4   :  { %2402 = vmatpush2.bf16.msra.mxu1 %v4847_v3  ;;  %v4889_v3 = vld [vmem:[%s6519_s5 + $0x1a0] ss:$8 sps:$4 sm:$0xff]  }
 0x467   :  { %v1815_v17 = vpop.f32.mrf.mxu1 }
 0x468   :  { %v1824_v19 = vadd.f32 %v1815_v17, %v1609_v15 }
 0x469   :  { %v1817_v22 = vpop.f32.mrf.mxu1 }
 0x46a   :  { %v1825_v24 = vadd.f32 %v1817_v22, %v1610_v18  ;;  %v1840_v28 = vadd.f32 %v1833_v20, %v1824_v19 }
 0x46b   :  { %v1819_v26 = vpop.f32.mrf.mxu1 }
 0x46c   :  { %v1826_v30 = vadd.f32 %v1819_v26, %v1611_v23  ;;  %v1841_v34 = vadd.f32 %v1837_v25, %v1825_v24  ;;  %v1844_v36 = vmax.f32 %v1840_v28, 0.0  ;;  %v4898_v28 = vld [vmem:[%s6519_s5 + $0x370] ss:$8 sps:$4 sm:$0xff]  }
 0x46d   :  { %v1821_v32 = vpop.f32.mrf.mxu1 }
 0x46e   :  { %v1842_v29 = vadd.f32 %v1833_v20, %v1826_v30  ;;  %v1827_v35 = vadd.f32 %v1821_v32, %v1612_v27  ;;  %v1845_v38 = vmax.f32 %v1841_v34, 0.0  ;;  %v4900_v20 = vld [vmem:[%s6519_s5 + $0x374] ss:$8 sps:$4 sm:$0xff]   ;;  %v4903_v32 = vld [vmem:[%s6519_s5 + $0x364] ss:$8 sps:$4 sm:$0xff]  }
 0x46f   :  { %v4906_v30 = vld [vmem:[%s6519_s5 + $0x274] ss:$8 sps:$4 sm:$0xff]  }
 0x470   :  { %v1846_v1 = vmax.f32 %v1842_v29, 0.0  ;;  %v1843_v37 = vadd.f32 %v1837_v25, %v1827_v35  ;;  %v4332_v25 = vld [vmem:[%s6518_s4 + $0xc] sm:$0xf]  ;;  %v4901_v29 = vld [vmem:[%s6519_s5 + $0x360] ss:$8 sps:$4 sm:$0xff]  }
 0x471   :  { %v4909_v35 = vld [vmem:[%s6519_s5 + $0x354] ss:$8 sps:$4 sm:$0xff]  }
 0x472   :  { %v5958_v39 = vpack.c.bf16 %v1846_v1, %v1844_v36  ;;  %v1847_v31 = vmax.f32 %v1843_v37, 0.0  ;;  %v4266_v36 = vld [vmem:[%s6518_s4 + $0x8] sm:$0xf]  ;;  %v4904_v1 = vld [vmem:[%s6519_s5 + $0x270] ss:$8 sps:$4 sm:$0xff]  }
 0x473   :  { %v4907_v37 = vld [vmem:[%s6519_s5 + $0x350] ss:$8 sps:$4 sm:$0xff]  }
 0x474   :  { %v5960_v40 = vpack.c.bf16 %v1847_v31, %v1845_v38  ;;  %v4912_v38 = vld [vmem:[%s6519_s5 + $0x264] ss:$8 sps:$4 sm:$0xff]   ;;  %v4910_v31 = vld [vmem:[%s6519_s5 + $0x260] ss:$8 sps:$4 sm:$0xff]  }
 0x476   :  { %1868 = vmatprep.subr.bf16.mxu0 %v5960_v40  ;;  %2715 = vmatprep.subr.bf16.mxu1 %v5960_v40 }
 0x477   :  { %1869 = vmatpush1.bf16.msra.mxu0 %v5958_v39 }
 0x478   :  { %1948 = vmatprep.subr.bf16.mxu0 %v5960_v40 }
 0x47a   :  { %4167 = vmatmul.mubr.msk.bf16.vlgmr.msra.gmra.mxu0 %vm355_vm2, %v1850_v33  ;;  %v4918_v33 = vld [vmem:[%s6519_s5 + $0x254] ss:$8 sps:$4 sm:$0xff]  }
 0x47b   :  { %1949 = vmatpush1.bf16.msra.mxu0 %v5958_v39  ;;  %1966 = vmatprep.mubr.bf16.mxu0 %v5076_v4 }
 0x47c   :  { %2170 = vmatprep.subr.bf16.mxu0 %v4852_v41  ;;  %v4921_v41 = vld [vmem:[%s6519_s5 + $0x334] ss:$8 sps:$4 sm:$0xff]  }
 0x482   :  { %4169 = vmatmul.mubr.msk.bf16.vlgmr.msra.gmra.mxu0 %vm355_vm2, %v4168_v43  ;;  %v4919_v43 = vld [vmem:[%s6519_s5 + $0x330] ss:$8 sps:$4 sm:$0xff]  }
 0x483   :  { %2171 = vmatpush1.bf16.msra.mxu0 %v4850_v42  ;;  %v4916_v42 = vld [vmem:[%s6519_s5 + $0x250] ss:$8 sps:$4 sm:$0xff]  }
 0x484   :  { %2172 = vmatprep.subr.bf16.mxu0 %v4855_v44  ;;  %v4924_v44 = vld [vmem:[%s6519_s5 + $0x244] ss:$8 sps:$4 sm:$0xff]  }
 0x487   :  { %2173 = vmatpush1.bf16.msra.mxu0 %v4853_v45  ;;  %v4927_v45 = vld [vmem:[%s6519_s5 + $0x324] ss:$8 sps:$4 sm:$0xff]  }
 0x488   :  { %2174 = vmatprep.subr.bf16.mxu0 %v4858_v46  ;;  %v4922_v46 = vld [vmem:[%s6519_s5 + $0x240] ss:$8 sps:$4 sm:$0xff]  }
 0x48b   :  { %2175 = vmatpush1.bf16.msra.mxu0 %v4856_v47  ;;  %v4925_v47 = vld [vmem:[%s6519_s5 + $0x320] ss:$8 sps:$4 sm:$0xff]  }
 0x48c   :  { %2176 = vmatprep.subr.bf16.mxu0 %v4861_v52  ;;  %v4930_v52 = vld [vmem:[%s6519_s5 + $0x234] ss:$8 sps:$4 sm:$0xff]  }
 0x48f   :  { %2177 = vmatpush1.bf16.msra.mxu0 %v4859_v48  ;;  %v4933_v48 = vld [vmem:[%s6519_s5 + $0x314] ss:$8 sps:$4 sm:$0xff]  }
 0x490   :  { %2178 = vmatprep.subr.bf16.mxu0 %v4864_v49  ;;  %v4928_v49 = vld [vmem:[%s6519_s5 + $0x230] ss:$8 sps:$4 sm:$0xff]  }
 0x493   :  { %2179 = vmatpush1.bf16.msra.mxu0 %v4862_v55  ;;  %v4931_v55 = vld [vmem:[%s6519_s5 + $0x310] ss:$8 sps:$4 sm:$0xff]  }
 0x494   :  { %2180 = vmatprep.subr.bf16.mxu0 %v4867_v50  ;;  %v4936_v50 = vld [vmem:[%s6519_s5 + $0x224] ss:$8 sps:$4 sm:$0xff]  }
 0x497   :  { %2181 = vmatpush1.bf16.msra.mxu0 %v4865_v59  ;;  %v4939_v59 = vld [vmem:[%s6519_s5 + $0x304] ss:$8 sps:$4 sm:$0xff]  }
 0x498   :  { %2182 = vmatprep.subr.bf16.mxu0 %v4870_v58  ;;  %v4934_v58 = vld [vmem:[%s6519_s5 + $0x220] ss:$8 sps:$4 sm:$0xff]  }
 0x49b   :  { %2183 = vmatpush1.bf16.msra.mxu0 %v4868_v51  ;;  %v4937_v51 = vld [vmem:[%s6519_s5 + $0x300] ss:$8 sps:$4 sm:$0xff]  }
 0x49c   :  { %2184 = vmatprep.subr.bf16.mxu0 %v4873_v53  ;;  %v4942_v53 = vld [vmem:[%s6519_s5 + $0x214] ss:$8 sps:$4 sm:$0xff]  }
 0x49f   :  { %2185 = vmatpush1.bf16.msra.mxu0 %v4871_v54  ;;  %v4945_v54 = vld [vmem:[%s6519_s5 + $0x3f4] ss:$8 sps:$4 sm:$0xff]  }
 0x4a0   :  { %2186 = vmatprep.subr.bf16.mxu0 %v4876_v56  ;;  %v4940_v56 = vld [vmem:[%s6519_s5 + $0x210] ss:$8 sps:$4 sm:$0xff]  }
 0x4a3   :  { %2187 = vmatpush2.bf16.msra.mxu0 %v4874_v57  ;;  %v4943_v57 = vld [vmem:[%s6519_s5 + $0x3f0] ss:$8 sps:$4 sm:$0xff]  }
 0x4a4   :  { %2188 = vmatprep.subr.bf16.mxu0 %v4879_v60  ;;  %v4948_v60 = vld [vmem:[%s6519_s5 + $0x204] ss:$8 sps:$4 sm:$0xff]  }
 0x4a7   :  { %2189 = vmatpush2.bf16.msra.mxu0 %v4877_v61  ;;  %v4951_v61 = vld [vmem:[%s6519_s5 + $0x3e4] ss:$8 sps:$4 sm:$0xff]  }
 0x4a8   :  { %2190 = vmatprep.subr.bf16.mxu0 %v4882_v62  ;;  %v4946_v62 = vld [vmem:[%s6519_s5 + $0x200] ss:$8 sps:$4 sm:$0xff]  }
 0x4ab   :  { %2191 = vmatpush2.bf16.msra.mxu0 %v4880_v63  ;;  %v4949_v63 = vld [vmem:[%s6519_s5 + $0x3e0] ss:$8 sps:$4 sm:$0xff]  }
 0x4ac   :  { %2192 = vmatprep.subr.bf16.mxu0 %v4885_v0  ;;  %v4954_v0 = vld [vmem:[%s6519_s5 + $0x2f4] ss:$8 sps:$4 sm:$0xff]  }
 0x4af   :  { %2193 = vmatpush2.bf16.msra.mxu0 %v4883_v2  ;;  %v4957_v2 = vld [vmem:[%s6519_s5 + $0x3d4] ss:$8 sps:$4 sm:$0xff]  }
 0x4b0   :  { %2194 = vmatprep.subr.bf16.mxu0 %v4888_v6  ;;  %v4952_v6 = vld [vmem:[%s6519_s5 + $0x2f0] ss:$8 sps:$4 sm:$0xff]  }
 0x4b3   :  { %2195 = vmatpush2.bf16.msra.mxu0 %v4886_v14  ;;  %v4955_v14 = vld [vmem:[%s6519_s5 + $0x3d0] ss:$8 sps:$4 sm:$0xff]  }
 0x4b4   :  { %2196 = vmatprep.subr.bf16.mxu0 %v4891_v5  ;;  %v4960_v5 = vld [vmem:[%s6519_s5 + $0x2e4] ss:$8 sps:$4 sm:$0xff]  }
 0x4b7   :  { %2197 = vmatpush2.bf16.msra.mxu0 %v4889_v3  ;;  %v4963_v3 = vld [vmem:[%s6519_s5 + $0x3c4] ss:$8 sps:$4 sm:$0xff]  }
 0x4b8   :  { %2198 = vmatprep.subr.bf16.mxu0 %v4894_v13  ;;  %v4958_v13 = vld [vmem:[%s6519_s5 + $0x2e0] ss:$8 sps:$4 sm:$0xff]  }
 0x4bb   :  { %2199 = vmatpush2.bf16.msra.mxu0 %v4892_v7  ;;  %v4961_v7 = vld [vmem:[%s6519_s5 + $0x3c0] ss:$8 sps:$4 sm:$0xff]  }
 0x4bc   :  { %2200 = vmatprep.subr.bf16.mxu0 %v4897_v9  ;;  %v4966_v9 = vld [vmem:[%s6519_s5 + $0x2d4] ss:$8 sps:$4 sm:$0xff]  }
 0x4bf   :  { %2201 = vmatpush2.bf16.msra.mxu0 %v4895_v11  ;;  %v4969_v11 = vld [vmem:[%s6519_s5 + $0x3b4] ss:$8 sps:$4 sm:$0xff]  }
 0x4c0   :  { %2431 = vmatprep.subr.bf16.mxu0 %v5960_v40  ;;  %v4913_v40 = vld [vmem:[%s6519_s5 + $0x340] ss:$8 sps:$4 sm:$0xff]  }
 0x53a   :  { %v1888_v16 = vpop.f32.mrf.mxu0 }
 0x53b   :  { %v1895_v18 = vpack.c.bf16 %v1888_v16, %v1888_v16  ;;  %v4964_v16 = vld [vmem:[%s6519_s5 + $0x2d0] ss:$8 sps:$4 sm:$0xff]  }
 0x53c   :  { %v1890_v15 = vpop.f32.mrf.mxu0 }
 0x53d   :  { %v1896_v17 = vpack.c.bf16 %v1890_v15, %v1890_v15  ;;  %v4967_v15 = vld [vmem:[%s6519_s5 + $0x3b0] ss:$8 sps:$4 sm:$0xff]  }
 0x53e   :  { %v1892_v19 = vpop.f32.mrf.mxu0 }
 0x53f   :  { %2403 = vmatprep.mubr.bf16.mxu1 %v1896_v17  ;;  %v4972_v17 = vld [vmem:[%s6519_s5 + $0x2c4] ss:$8 sps:$4 sm:$0xff]   ;;  %v4973_v19 = vld [vmem:[%s6519_s5 + $0x3a0] ss:$8 sps:$4 sm:$0xff]  }
 0x540   :  { %v1893_v21 = vpop.f32.mrf.mxu0  ;;  %2404 = vmatmul.mubr.bf16.vlgmr.msra.gmra.mxu1 %v1895_v18  ;;  %v4970_v18 = vld [vmem:[%s6519_s5 + $0x2c0] ss:$8 sps:$4 sm:$0xff]  }
 0x541   :  { %2716 = vmatpush1.bf16.msra.mxu1 %v5958_v39  ;;  %2733 = vmatprep.mubr.bf16.mxu1 %v5076_v4  ;;  %v4978_v21 = vld [vmem:[%s6519_s5 + $0x2b4] ss:$8 sps:$4 sm:$0xff]  }
 0x542   :  { %v1968_v22 = vpop.f32.mrf.mxu0  ;;  %2937 = vmatprep.subr.bf16.mxu1 %v4900_v20  ;;  %v4975_v20 = vld [vmem:[%s6519_s5 + $0x3a4] ss:$8 sps:$4 sm:$0xff]  }
 0x543   :  { %v1975_v26 = vpack.c.bf16 %v1968_v22, %v1968_v22  ;;  %v4976_v22 = vld [vmem:[%s6519_s5 + $0x2b0] ss:$8 sps:$4 sm:$0xff]  }
 0x544   :  { %v1970_v23 = vpop.f32.mrf.mxu0 }
 0x545   :  { %v1976_v24 = vpack.c.bf16 %v1970_v23, %v1970_v23  ;;  %v4979_v23 = vld [vmem:[%s6519_s5 + $0x390] ss:$8 sps:$4 sm:$0xff]  }
 0x546   :  { %v1972_v27 = vpop.f32.mrf.mxu0 }
 0x547   :  { %2202 = vmatprep.mubr.bf16.mxu0 %v1976_v24  ;;  %v4981_v24 = vld [vmem:[%s6519_s5 + $0x394] ss:$8 sps:$4 sm:$0xff]   ;;  %v4987_v27 = vld [vmem:[%s6519_s5 + $0x384] ss:$8 sps:$4 sm:$0xff]  }
 0x548   :  { %v1973_v34 = vpop.f32.mrf.mxu0  ;;  %2203 = vmatmul.mubr.bf16.vlgmr.msra.gmra.mxu0 %v1975_v26  ;;  %4333 = vmatmul.mubr.msk.bf16.vlgmr.msra.gmra.mxu1 %vm355_vm2, %v4332_v25  ;;  %v4984_v25 = vld [vmem:[%s6519_s5 + $0x2a4] ss:$8 sps:$4 sm:$0xff]   ;;  %v4982_v26 = vld [vmem:[%s6519_s5 + $0x2a0] ss:$8 sps:$4 sm:$0xff]  }
 0x549   :  { %2432 = vmatpush1.bf16.msra.mxu0 %v5958_v39  ;;  %2449 = vmatprep.mubr.bf16.mxu0 %v5076_v4  ;;  %v4915_v39 = vld [vmem:[%s6519_s5 + $0x344] ss:$8 sps:$4 sm:$0xff]  }
 0x54a   :  { %2938 = vmatpush1.bf16.msra.mxu1 %v4898_v28  ;;  %2653 = vmatprep.subr.bf16.mxu0 %v4906_v30  ;;  %v4985_v28 = vld [vmem:[%s6519_s5 + $0x380] ss:$8 sps:$4 sm:$0xff]   ;;  %v4990_v30 = vld [vmem:[%s6519_s5 + $0x294] ss:$8 sps:$4 sm:$0xff]   ;;  %v4993_v34 = vld [vmem:[%s6519_s5 + $0x284] ss:$8 sps:$4 sm:$0xff]  }
 0x54b   :  { %2939 = vmatprep.subr.bf16.mxu1 %v4903_v32  ;;  %v4988_v32 = vld [vmem:[%s6519_s5 + $0x290] ss:$8 sps:$4 sm:$0xff]  }
 0x54e   :  { %2940 = vmatpush1.bf16.msra.mxu1 %v4901_v29  ;;  %v4991_v29 = vld [vmem:[%s6519_s5 + $0x280] ss:$8 sps:$4 sm:$0xff]   ;;  %s3833_s5 = sshll.u32 %s5080_s29, 4  ;;  %s3834_s5 = int_to_ptr.vmem [resolvable:$true] %s3833_s5 }
 0x54f   :  { %2941 = vmatprep.subr.bf16.mxu1 %v4909_v35  ;;  %p5059_p1 = scmp.lt.s32.totalorder %s3834_s5, %s3834_s5 }
 0x550   :  { %4267 = vmatmul.mubr.msk.bf16.vlgmr.msra.gmra.mxu0 %vm355_vm2, %v4266_v36 }
 0x551   :  { %2654 = vmatpush1.bf16.msra.mxu0 %v4904_v1 }
 0x552   :  { %2942 = vmatpush1.bf16.msra.mxu1 %v4907_v37  ;;  %2655 = vmatprep.subr.bf16.mxu0 %v4912_v38 }
 0x553   :  { %2943 = vmatprep.subr.bf16.mxu1 %v4915_v39 }
 0x555   :  { %2656 = vmatpush1.bf16.msra.mxu0 %v4910_v31 }
 0x556   :  { %2944 = vmatpush1.bf16.msra.mxu1 %v4913_v40  ;;  %2657 = vmatprep.subr.bf16.mxu0 %v4918_v33 }
 0x557   :  { %2945 = vmatprep.subr.bf16.mxu1 %v4921_v41 }
 0x559   :  { %2658 = vmatpush1.bf16.msra.mxu0 %v4916_v42 }
 0x55a   :  { %2946 = vmatpush1.bf16.msra.mxu1 %v4919_v43  ;;  %2659 = vmatprep.subr.bf16.mxu0 %v4924_v44 }
 0x55b   :  { %2947 = vmatprep.subr.bf16.mxu1 %v4927_v45 }
 0x55d   :  { %2660 = vmatpush1.bf16.msra.mxu0 %v4922_v46 }
 0x55e   :  { %2948 = vmatpush1.bf16.msra.mxu1 %v4925_v47  ;;  %2661 = vmatprep.subr.bf16.mxu0 %v4930_v52 }
 0x55f   :  { %2949 = vmatprep.subr.bf16.mxu1 %v4933_v48 }
 0x561   :  { %2662 = vmatpush1.bf16.msra.mxu0 %v4928_v49 }
 0x562   :  { %2950 = vmatpush1.bf16.msra.mxu1 %v4931_v55  ;;  %2663 = vmatprep.subr.bf16.mxu0 %v4936_v50 }
 0x563   :  { %2951 = vmatprep.subr.bf16.mxu1 %v4939_v59 }
 0x565   :  { %2664 = vmatpush1.bf16.msra.mxu0 %v4934_v58  ;;  %v5006_v58 = vld [vmem:[%s6522_s8 + $0x38] sm:$0xff]  }
 0x566   :  { %2952 = vmatpush1.bf16.msra.mxu1 %v4937_v51  ;;  %2665 = vmatprep.subr.bf16.mxu0 %v4942_v53  ;;  %v5007_v51 = vld [vmem:[%s6522_s8 + $0x30] sm:$0xff]   ;;  %v5008_v53 = vld [vmem:[%s6522_s8 + $0x28] sm:$0xff]  }
 0x567   :  { %2953 = vmatprep.subr.bf16.mxu1 %v4945_v54  ;;  %v5009_v54 = vld [vmem:[%s6522_s8 + $0x20] sm:$0xff]  }
 0x569   :  { %2666 = vmatpush1.bf16.msra.mxu0 %v4940_v56  ;;  %v5010_v56 = vld [vmem:[%s6522_s8 + $0x18] sm:$0xff]  }
 0x56a   :  { %2954 = vmatpush2.bf16.msra.mxu1 %v4943_v57  ;;  %2667 = vmatprep.subr.bf16.mxu0 %v4948_v60  ;;  %v5011_v57 = vld [vmem:[%s6522_s8 + $0x10] sm:$0xff]   ;;  %v5012_v60 = vld [vmem:[%s6522_s8 + $0x8] sm:$0xff]  }
 0x56b   :  { %2955 = vmatprep.subr.bf16.mxu1 %v4951_v61  ;;  %v5013_v61 = vld [vmem:[%s6522_s8] sm:$0xff]  }
 0x56d   :  { %2668 = vmatpush1.bf16.msra.mxu0 %v4946_v62  ;;  %v5014_v62 = vld [vmem:[%s6522_s8 + $0x58] sm:$0xff]  }
 0x56e   :  { %2956 = vmatpush2.bf16.msra.mxu1 %v4949_v63  ;;  %2669 = vmatprep.subr.bf16.mxu0 %v4954_v0  ;;  %v5015_v63 = vld [vmem:[%s6522_s8 + $0x50] sm:$0xff]   ;;  %v5016_v0 = vld [vmem:[%s6522_s8 + $0x48] sm:$0xff]  }
 0x56f   :  { %2957 = vmatprep.subr.bf16.mxu1 %v4957_v2 }
 0x571   :  { %2670 = vmatpush2.bf16.msra.mxu0 %v4952_v6 }
 0x572   :  { %2958 = vmatpush2.bf16.msra.mxu1 %v4955_v14  ;;  %2671 = vmatprep.subr.bf16.mxu0 %v4960_v5 }
 0x573   :  { %2959 = vmatprep.subr.bf16.mxu1 %v4963_v3  ;;  %v2980_v3 = vld [vmem:[%s6520_s6] sm:$0x3] }
 0x575   :  { %2672 = vmatpush2.bf16.msra.mxu0 %v4958_v13 }
 0x576   :  { %2960 = vmatpush2.bf16.msra.mxu1 %v4961_v7  ;;  %2673 = vmatprep.subr.bf16.mxu0 %v4966_v9  ;;  %v2985_v9 = vrot.slane %v2980_v3, %v1832_v10  ;;  %v4400_v10 = vld [vmem:[%s6521_s7 + $0x1] sm:$0x1] }
 0x577   :  { %2961 = vmatprep.subr.bf16.mxu1 %v4969_v11 }
 0x579   :  { %2674 = vmatpush2.bf16.msra.mxu0 %v4964_v16 }
 0x57a   :  { %2962 = vmatpush2.bf16.msra.mxu1 %v4967_v15  ;;  %2675 = vmatprep.subr.bf16.mxu0 %v4972_v17  ;;  %v2989_v17 = vrot.slane %v2980_v3, %v1836_v12  ;;  %v4994_v12 = vld [vmem:[%s6522_s8 + $0x98] sm:$0xff]  }
 0x57b   :  { %2963 = vmatprep.subr.bf16.mxu1 %v4975_v20 }
 0x57d   :  { %2676 = vmatpush2.bf16.msra.mxu0 %v4970_v18 }
 0x57e   :  { %2964 = vmatpush2.bf16.msra.mxu1 %v4973_v19  ;;  %2677 = vmatprep.subr.bf16.mxu0 %v4978_v21 }
 0x57f   :  { %2965 = vmatprep.subr.bf16.mxu1 %v4981_v24 }
 0x581   :  { %2678 = vmatpush2.bf16.msra.mxu0 %v4976_v22 }
 0x582   :  { %2966 = vmatpush2.bf16.msra.mxu1 %v4979_v23  ;;  %2679 = vmatprep.subr.bf16.mxu0 %v4984_v25 }
 0x583   :  { %2967 = vmatprep.subr.bf16.mxu1 %v4987_v27 }
 0x585   :  { %2680 = vmatpush2.bf16.msra.mxu0 %v4982_v26 }
 0x586   :  { %2968 = vmatpush2.bf16.msra.mxu1 %v4985_v28  ;;  %2681 = vmatprep.subr.bf16.mxu0 %v4990_v30  ;;  %v4995_v28 = vld [vmem:[%s6522_s8 + $0x90] sm:$0xff]   ;;  %v4996_v30 = vld [vmem:[%s6522_s8 + $0x88] sm:$0xff]  }
 0x587   :  { %3340 = vmatprep.subr.bf16.mxu1 %v5076_v4 }
 0x589   :  { %2682 = vmatpush2.bf16.msra.mxu0 %v4988_v32  ;;  %v4997_v32 = vld [vmem:[%s6522_s8 + $0x80] sm:$0xff]  }
 0x58a   :  { %2683 = vmatprep.subr.bf16.mxu0 %v4993_v34  ;;  %v4998_v34 = vld [vmem:[%s6522_s8 + $0x78] sm:$0xff]  }
 0x58d   :  { %2684 = vmatpush2.bf16.msra.mxu0 %v4991_v29  ;;  %v4999_v29 = vld [vmem:[%s6522_s8 + $0x70] sm:$0xff]  }
 0x600   :  { %v2405_v35 = vpop.f32.mrf.mxu1 }
 0x602   :  { %v2407_v36 = vpop.f32.mrf.mxu1 }
 0x604   :  { %v2409_v1 = vpop.f32.mrf.mxu1 }
 0x605   :  { %v5002_v1 = vld [vmem:[%s6522_s8 + $0xb8] sm:$0xff]  }
 0x606   :  { %v2410_v37 = vpop.f32.mrf.mxu1 }
 0x607   :  { %v5003_v37 = vld [vmem:[%s6522_s8 + $0xb0] sm:$0xff]  }
 0x608   :  { %v2204_v38 = vpop.f32.mrf.mxu0  ;;  %v2735_v39 = vpop.f32.mrf.mxu1 }
 0x609   :  { %v2406_v31 = vadd.f32 %v2405_v35, %v2204_v38  ;;  %v2742_v40 = vpack.c.bf16 %v2735_v39, %v2735_v39  ;;  %v5000_v35 = vld [vmem:[%s6522_s8 + $0x68] sm:$0xff]   ;;  %v5005_v39 = vld [vmem:[%s6522_s8 + $0xa0] sm:$0xff]  }
 0x60a   :  { %v2206_v33 = vpop.f32.mrf.mxu0  ;;  %v2737_v41 = vpop.f32.mrf.mxu1  ;;  %v5004_v38 = vld [vmem:[%s6522_s8 + $0xa8] sm:$0xff]  }
 0x60b   :  { %v2408_v42 = vadd.f32 %v2407_v36, %v2206_v33  ;;  %v2743_v43 = vpack.c.bf16 %v2737_v41, %v2737_v41  ;;  %v5001_v36 = vld [vmem:[%s6522_s8 + $0x60] sm:$0xff]  }
 0x60c   :  { %v2208_v44 = vpop.f32.mrf.mxu0  ;;  %v2739_v45 = vpop.f32.mrf.mxu1 }
 0x60d   :  { %2969 = vmatprep.mubr.bf16.mxu1 %v2743_v43 }
 0x60e   :  { %v2209_v46 = vpop.f32.mrf.mxu0  ;;  %2970 = vmatmul.mubr.bf16.vlgmr.msra.gmra.mxu1 %v2742_v40  ;;  %v2740_v47 = vpop.f32.mrf.mxu1 }
 0x60f   :  { %3341 = vmatpush1.bf16.msra.mxu1 %v5006_v58  ;;  %v5019_v46 = vld [vmem:[%s6522_s8 + $0xf0] sm:$0xff]   ;;  %v5021_v58 = vld [vmem:[%s6522_s8 + $0xe0] sm:$0xff]  }
 0x610   :  { %v2451_v52 = vpop.f32.mrf.mxu0  ;;  %3342 = vmatprep.subr.bf16.mxu1 %v5076_v4 }
 0x611   :  { %v2458_v55 = vpack.c.bf16 %v2451_v52, %v2451_v52 }
 0x612   :  { %v2453_v48 = vpop.f32.mrf.mxu0 }
 0x613   :  { %v2459_v49 = vpack.c.bf16 %v2453_v48, %v2453_v48  ;;  %3343 = vmatpush1.bf16.msra.mxu1 %v5007_v51  ;;  %v4453_v51 = vld [vmem:[%s6521_s7 + $0x2] sm:$0x1] }
 0x614   :  { %v2455_v50 = vpop.f32.mrf.mxu0  ;;  %3344 = vmatprep.subr.bf16.mxu1 %v5076_v4 }
 0x615   :  { %2685 = vmatprep.mubr.bf16.mxu0 %v2459_v49  ;;  %v5020_v50 = vld [vmem:[%s6522_s8 + $0xe8] sm:$0xff]  }
 0x616   :  { %v2456_v59 = vpop.f32.mrf.mxu0  ;;  %2686 = vmatmul.mubr.bf16.vlgmr.msra.gmra.mxu0 %v2458_v55 }
 0x617   :  { %3041 = vmatprep.mubr.bf16.mxu0 %v5076_v4  ;;  %3345 = vmatpush1.bf16.msra.mxu1 %v5008_v53  ;;  %v5022_v53 = vld [vmem:[%s6522_s8 + $0xd8] sm:$0xff]  }
 0x618   :  { %3346 = vmatprep.subr.bf16.mxu1 %v5076_v4 }
 0x61b   :  { %3347 = vmatpush1.bf16.msra.mxu1 %v5009_v54  ;;  %v5023_v54 = vld [vmem:[%s6522_s8 + $0xd0] sm:$0xff]  }
 0x61c   :  { %3348 = vmatprep.subr.bf16.mxu1 %v5076_v4 }
 0x61f   :  { %3349 = vmatpush1.bf16.msra.mxu1 %v5010_v56  ;;  %v5024_v56 = vld [vmem:[%s6522_s8 + $0xc8] sm:$0xff]  }
 0x620   :  { %3350 = vmatprep.subr.bf16.mxu1 %v5076_v4 }
 0x623   :  { %3351 = vmatpush1.bf16.msra.mxu1 %v5011_v57  ;;  %v5025_v57 = vld [vmem:[%s6522_s8 + $0xc0] sm:$0xff]  }
 0x624   :  { %3352 = vmatprep.subr.bf16.mxu1 %v5076_v4 }
 0x627   :  { %3353 = vmatpush1.bf16.msra.mxu1 %v5012_v60  ;;  %v5026_v60 = vld [vmem:[%s6522_s8 + $0x118] sm:$0xff]  }
 0x628   :  { %3354 = vmatprep.subr.bf16.mxu1 %v5076_v4 }
 0x62b   :  { %3355 = vmatpush1.bf16.msra.mxu1 %v5013_v61  ;;  %v5027_v61 = vld [vmem:[%s6522_s8 + $0x110] sm:$0xff]  }
 0x62c   :  { %3364 = vmatprep.subr.bf16.mxu1 %v5076_v4 }
 0x62f   :  { %3365 = vmatpush2.bf16.msra.mxu1 %v5014_v62  ;;  %v5028_v62 = vld [vmem:[%s6522_s8 + $0x108] sm:$0xff]  }
 0x630   :  { %3366 = vmatprep.subr.bf16.mxu1 %v5076_v4 }
 0x633   :  { %3367 = vmatpush2.bf16.msra.mxu1 %v5015_v63  ;;  %v5029_v63 = vld [vmem:[%s6522_s8 + $0x100] sm:$0xff]  }
 0x634   :  { %3368 = vmatprep.subr.bf16.mxu1 %v5076_v4 }
 0x637   :  { %3369 = vmatpush2.bf16.msra.mxu1 %v5016_v0 }
 0x638   :  { %3370 = vmatprep.subr.bf16.mxu1 %v5076_v4 }
 0x6ce   :  { %v2971_v2 = vpop.f32.mrf.mxu1 }
 0x6d0   :  { %v2973_v6 = vpop.f32.mrf.mxu1 }
 0x6d2   :  { %v2975_v14 = vpop.f32.mrf.mxu1 }
 0x6d4   :  { %v2976_v5 = vpop.f32.mrf.mxu1 }
 0x6d6   :  { %v2687_v13 = vpop.f32.mrf.mxu0 }
 0x6d7   :  { %v2694_v7 = vadd.f32 %v2687_v13, %v2406_v31  ;;  %v5017_v31 = vld [vmem:[%s6522_s8 + $0x40] sm:$0xff]  }
 0x6d8   :  { %v2689_v11 = vpop.f32.mrf.mxu0  ;;  %3371 = vmatpush2.bf16.msra.mxu1 %v5017_v31  ;;  %v4494_v31 = vld [vmem:[%s6524_s10] ss:$0 sm:$0xff] }
 0x6d9   :  { %v2978_v16 = vadd.f32 %v2971_v2, %v2694_v7  ;;  %v2695_v15 = vadd.f32 %v2689_v11, %v2408_v42  ;;  %3528 = vmatprep.subr.bf16.mxu1 %v5076_v4  ;;  %v5018_v42 = vld [vmem:[%s6522_s8 + $0xf8] sm:$0xff]  }
 0x6da   :  { %v2691_v18 = vpop.f32.mrf.mxu0 }
 0x6db   :  { %v2992_v19 = vadd.f32 %v2985_v9, %v2978_v16  ;;  %v2979_v20 = vadd.f32 %v2973_v6, %v2695_v15 }
 0x6dc   :  { %v2692_v21 = vpop.f32.mrf.mxu0 }
 0x6dd   :  { %v2994_v22 = vmax.f32 %v2992_v19, 0.0  ;;  %v2993_v23 = vadd.f32 %v2989_v17, %v2979_v20  ;;  %v4493_v20 = vld [vmem:[%s6523_s9] ss:$0 sm:$0xff] }
 0x6df   :  { %v2995_v24 = vmax.f32 %v2993_v23, 0.0  ;;  %v2996_v25 = vpack.c.bf16 %v2994_v22, %v2994_v22 }
 0x6e1   :  { %v2997_v26 = vpack.c.bf16 %v2995_v24, %v2995_v24  ;;  %v6332_v27 = vsel %vm120_vm0, %v2996_v25, 0 }
 0x6e3   :  { %4398 = vmatprep.subr.msk.bf16.mxu0 %vm120_vm0, %v2997_v26 }
 0x6e4   :  { %3024 = vmatpush1.bf16.msra.mxu0 %v6332_v27 }
 0x6e5   :  { %4401 = vmatprep.subr.msk.bf16.mxu0 %vm120_vm0, %v2997_v26 }
 0x6e7   :  { %4399 = vmatmul.mubr.msk.bf16.vlgmr.msra.gmra.mxu0 %vm2999_vm3, %v2998_v8 }
 0x6e8   :  { %3096 = vmatpush1.bf16.msra.mxu0 %v6332_v27  ;;  %3113 = vmatprep.mubr.bf16.mxu0 %v5076_v4 }
 0x6e9   :  { %3225 = vmatprep.subr.bf16.mxu0 %v5076_v4 }
 0x6ef   :  { %4402 = vmatmul.mubr.msk.bf16.vlgmr.msra.gmra.mxu0 %vm2999_vm3, %v4400_v10 }
 0x6f0   :  { %3226 = vmatpush1.bf16.msra.mxu0 %v4994_v12 }
 0x6f1   :  { %3227 = vmatprep.subr.bf16.mxu0 %v5076_v4 }
 0x6f4   :  { %3228 = vmatpush1.bf16.msra.mxu0 %v4995_v28 }
 0x6f5   :  { %3229 = vmatprep.subr.bf16.mxu0 %v5076_v4 }
 0x6f8   :  { %3230 = vmatpush1.bf16.msra.mxu0 %v4996_v30 }
 0x6f9   :  { %3231 = vmatprep.subr.bf16.mxu0 %v5076_v4 }
 0x6fc   :  { %3232 = vmatpush1.bf16.msra.mxu0 %v4997_v32  ;;  %v5030_v32 = vld [vmem:[%s6526_s12 + $0x18] sm:$0xff]  }
 0x6fd   :  { %3233 = vmatprep.subr.bf16.mxu0 %v5076_v4 }
 0x700   :  { %3234 = vmatpush1.bf16.msra.mxu0 %v4998_v34  ;;  %v5077_v34 = vmov 0.0  }
 0x701   :  { %3235 = vmatprep.subr.bf16.mxu0 %v5076_v4 }
 0x704   :  { %3236 = vmatpush1.bf16.msra.mxu0 %v4999_v29  ;;  %v5031_v29 = vld [vmem:[%s6526_s12 + $0x10] sm:$0xff]  }
 0x705   :  { %3237 = vmatprep.subr.bf16.mxu0 %v5076_v4 }
 0x708   :  { %3238 = vmatpush1.bf16.msra.mxu0 %v5000_v35  ;;  %v5032_v35 = vld [vmem:[%s6526_s12 + $0x8] sm:$0xff]  }
 0x709   :  { %3239 = vmatprep.subr.bf16.mxu0 %v5076_v4 }
 0x70c   :  { %3240 = vmatpush1.bf16.msra.mxu0 %v5001_v36  ;;  %v5033_v36 = vld [vmem:[%s6526_s12] sm:$0xff]  }
 0x70d   :  { %3249 = vmatprep.subr.bf16.mxu0 %v5076_v4 }
 0x710   :  { %3250 = vmatpush2.bf16.msra.mxu0 %v5002_v1 }
 0x711   :  { %3251 = vmatprep.subr.bf16.mxu0 %v5076_v4 }
 0x714   :  { %3252 = vmatpush2.bf16.msra.mxu0 %v5003_v37 }
 0x715   :  { %3253 = vmatprep.subr.bf16.mxu0 %v5076_v4 }
 0x718   :  { %3254 = vmatpush2.bf16.msra.mxu0 %v5004_v38 }
 0x719   :  { %3255 = vmatprep.subr.bf16.mxu0 %v5076_v4 }
 0x71c   :  { %3256 = vmatpush2.bf16.msra.mxu0 %v5005_v39 }
 0x71d   :  { %4454 = vmatprep.subr.msk.bf16.mxu0 %vm120_vm0, %v2997_v26 }
 0x7a7   :  { %v3043_v40 = vpop.f32.mrf.mxu0 }
 0x7a8   :  { %v3050_v43 = vpack.c.bf16 %v3043_v40, %v3043_v40 }
 0x7a9   :  { %v3045_v33 = vpop.f32.mrf.mxu0 }
 0x7aa   :  { %v3051_v41 = vpack.c.bf16 %v3045_v33, %v3045_v33  ;;  %v4495_v33 = vld [vmem:[%s6525_s11] ss:$0 sm:$0xff] }
 0x7ab   :  { %v3047_v44 = vpop.f32.mrf.mxu0 }
 0x7ac   :  { %4452 = vmatprep.mubr.msk.bf16.mxu1 %vm3221_vm4, %v3051_v41  ;;  %v5034_v44 = vld [vmem:[%s6528_s14 + $0x38] sm:$0xff]  }
 0x7ad   :  { %v3048_v45 = vpop.f32.mrf.mxu0  ;;  %3373 = vmatmul.mubr.bf16.vlgmr.msra.gmra.mxu1 %v3050_v43 }
 0x7ae   :  { %3529 = vmatpush1.bf16.msra.mxu1 %v5018_v42  ;;  %v5035_v45 = vld [vmem:[%s6528_s14 + $0x30] sm:$0xff]  }
 0x7af   :  { %v3115_v47 = vpop.f32.mrf.mxu0  ;;  %3530 = vmatprep.subr.bf16.mxu1 %v5076_v4 }
 0x7b0   :  { %v3122_v49 = vpack.c.bf16 %v3115_v47, %v3115_v47  ;;  %v5037_v47 = vld [vmem:[%s6528_s14 + $0x20] sm:$0xff]  }
 0x7b1   :  { %v3117_v52 = vpop.f32.mrf.mxu0 }
 0x7b2   :  { %v3123_v48 = vpack.c.bf16 %v3117_v52, %v3117_v52  ;;  %3531 = vmatpush1.bf16.msra.mxu1 %v5019_v46  ;;  %v5036_v46 = vld [vmem:[%s6528_s14 + $0x28] sm:$0xff]   ;;  %v5038_v52 = vld [vmem:[%s6528_s14 + $0x18] sm:$0xff]  }
 0x7b3   :  { %v3119_v55 = vpop.f32.mrf.mxu0  ;;  %3532 = vmatprep.subr.bf16.mxu1 %v5076_v4 }
 0x7b4   :  { %4439 = vmatprep.mubr.msk.bf16.mxu0 %vm3221_vm4, %v3123_v48  ;;  %v5039_v48 = vld [vmem:[%s6528_s14 + $0x10] sm:$0xff]   ;;  %v5041_v55 = vld [vmem:[%s6528_s14] sm:$0xff]  }
 0x7b5   :  { %v3120_v59 = vpop.f32.mrf.mxu0  ;;  %3258 = vmatmul.mubr.bf16.vlgmr.msra.gmra.mxu0 %v3122_v49  ;;  %v5040_v49 = vld [vmem:[%s6528_s14 + $0x8] sm:$0xff]  }
 0x7b6   :  { %3400 = vmatpush1.bf16.msra.mxu0 %v6332_v27  ;;  %3417 = vmatprep.mubr.bf16.mxu0 %v5076_v4 }
 0x7b7   :  { %3533 = vmatpush1.bf16.msra.mxu1 %v5020_v50  ;;  %4525 = vmatprep.subr.bf16.mxu0 %v5077_v34  ;;  %v4496_v50 = vld [vmem:[%s6527_s13] ss:$0 sm:$0xff] }
 0x7b8   :  { %3534 = vmatprep.subr.bf16.mxu1 %v5076_v4 }
 0x7bb   :  { %3535 = vmatpush1.bf16.msra.mxu1 %v5021_v58 }
 0x7bc   :  { %3536 = vmatprep.subr.bf16.mxu1 %v5076_v4 }
 0x7bd   :  { %4455 = vmatmul.mubr.msk.bf16.vlgmr.msra.gmra.mxu0 %vm2999_vm3, %v4453_v51 }
 0x7be   :  { %4526 = vmatpush3.bf16.msra.mxu0 %v5030_v32  ;;  %4533 = vmatprep.mubr.msk.bf16.mxu0 %vm5078_vm6, %v5077_v34 }
 0x7bf   :  { %3537 = vmatpush1.bf16.msra.mxu1 %v5022_v53  ;;  %4527 = vmatprep.subr.bf16.mxu0 %v5077_v34 }
 0x7c0   :  { %3538 = vmatprep.subr.bf16.mxu1 %v5076_v4 }
 0x7c2   :  { %4528 = vmatpush3.bf16.msra.mxu0 %v5031_v29 }
 0x7c3   :  { %3539 = vmatpush1.bf16.msra.mxu1 %v5023_v54  ;;  %4529 = vmatprep.subr.bf16.mxu0 %v5077_v34 }
 0x7c4   :  { %3540 = vmatprep.subr.bf16.mxu1 %v5076_v4 }
 0x7c6   :  { %4530 = vmatpush3.bf16.msra.mxu0 %v5032_v35 }
 0x7c7   :  { %3541 = vmatpush1.bf16.msra.mxu1 %v5024_v56  ;;  %4531 = vmatprep.subr.bf16.mxu0 %v5077_v34 }
 0x7c8   :  { %3542 = vmatprep.subr.bf16.mxu1 %v5076_v4 }
 0x7ca   :  { %4532 = vmatpush3.bf16.msra.mxu0 %v5033_v36 }
 0x7cb   :  { %3543 = vmatpush1.bf16.msra.mxu1 %v5025_v57  ;;  %4537 = vmatprep.subr.bf16.mxu0 %v5077_v34 }
 0x7cc   :  { %3552 = vmatprep.subr.bf16.mxu1 %v5076_v4 }
 0x7cf   :  { %3553 = vmatpush2.bf16.msra.mxu1 %v5026_v60 }
 0x7d0   :  { %3554 = vmatprep.subr.bf16.mxu1 %v5076_v4 }
 0x7d3   :  { %3555 = vmatpush2.bf16.msra.mxu1 %v5027_v61 }
 0x7d4   :  { %3556 = vmatprep.subr.bf16.mxu1 %v5076_v4 }
 0x7d7   :  { %3557 = vmatpush2.bf16.msra.mxu1 %v5028_v62 }
 0x7d8   :  { %3558 = vmatprep.subr.bf16.mxu1 %v5076_v4 }
 0x7db   :  { %3559 = vmatpush2.bf16.msra.mxu1 %v5029_v63 }
 0x86d   :  { %v3374_v0 = vpop.f32.mrf.mxu1 }
 0x86f   :  { %v3376_v2 = vpop.f32.mrf.mxu1 }
 0x871   :  { %v3377_v6 = vpop.f32.mrf.mxu1 }
 0x873   :  { %v3378_v14 = vpop.f32.mrf.mxu1 }
 0x875   :  { %v3259_v5 = vpop.f32.mrf.mxu0 }
 0x876   :  { %v3375_v3 = vadd.f32 %v3374_v0, %v3259_v5  ;;  %v5079_v5 = vmov 6  }
 0x877   :  { %v3261_v13 = vpop.f32.mrf.mxu0  ;;  %4562 = vset.pattern.permute.xlu1 %v5079_v5  ;;  %4563 = vset.pattern.permute.xlu0 %v5079_v5 }
 0x879   :  { %v3262_v7 = vpop.f32.mrf.mxu0 }
 0x87b   :  { %v3263_v9 = vpop.f32.mrf.mxu0 }
 0x87d   :  { %v3419_v11 = vpop.f32.mrf.mxu0 }
 0x87e   :  { %v3426_v17 = vpack.c.bf16 %v3419_v11, %v3419_v11 }
 0x87f   :  { %v3421_v16 = vpop.f32.mrf.mxu0 }
 0x880   :  { %v3427_v15 = vpack.c.bf16 %v3421_v16, %v3421_v16 }
 0x881   :  { %v3423_v18 = vpop.f32.mrf.mxu0 }
 0x882   :  { %4492 = vmatprep.mubr.msk.bf16.mxu1 %vm3221_vm4, %v3427_v15 }
 0x883   :  { %v3424_v4 = vpop.f32.mrf.mxu0  ;;  %3561 = vmatmul.mubr.bf16.vlgmr.msra.gmra.mxu1 %v3426_v17 }
 0x943   :  { %v3562_v19 = vpop.f32.mrf.mxu1 }
 0x944   :  { %v3568_v21 = vadd.f32 %v3562_v19, %v3375_v3  ;;  %v4502_v3 = vld [vmem:[%s6529_s15] ss:$0 sm:$0xff]  ;;  %s5054_s15 = scalar_lea.vmem %s3834_s5, 32 }
 0x945   :  { %v3564_v22 = vpop.f32.mrf.mxu1  ;;  %p5055_p0 = scmp.ne.s32.totalorder %s3834_s5, %s5054_s15  ;;  %p5060_p2 = scmp.lt.s32.totalorder %s5054_s15, %s5054_s15 }
 0x946   :  { %v3576_v23 = vadd.f32 %v4493_v20, %v3568_v21 }
 0x947   :  { %v3565_v24 = vpop.f32.mrf.mxu1  ;;  %p5061_p3 = por %p5060_p2, %p5059_p1 }
 0x948   :  { %v3577_v25 = vmax.f32 %v3576_v23, 0.0 }
 0x949   :  { %v3566_v26 = vpop.f32.mrf.mxu1  ;;  %p5062_p4 = pnand %p5061_p3, %p5055_p0 }
 0x94a   :  { %v3579_v27 = vsel %vm3578_vm5, %v3577_v25, 0.0 }
 0x94b   :  { %3580 = vadd.xlane.f32.xlu0 %v3579_v27 }
 0x9d4   :  { %v3581_v8 = vpop.xlane.xlu0 %3580 }
 0x9d5   :  { %v3583_v10 = vmul.f32 0.015625, %v3581_v8 }
 0x9d7   :  { %v3584_v12 = vsub.f32 %v3577_v25, %v3583_v10 }
 0x9d9   :  { %v3585_v28 = vmul.f32 %v3584_v12, %v3584_v12 }
 0x9db   :  { %v3586_v30 = vsel %vm3578_vm5, %v3585_v28, 0.0 }
 0x9dc   :  { %3587 = vadd.xlane.f32.xlu0 %v3586_v30 }
 0xa65   :  { %v3588_v1 = vpop.xlane.xlu0 %3587 }
 0xa66   :  { %v3589_v37 = vmul.f32 0.015625, %v3588_v1 }
 0xa68   :  { %v3590_v38 = vadd.f32 1e-05, %v3589_v37 }
 0xa6a   :  { %5042 = vrsqrt.f32 %v3590_v38 }
 0xa77   :  { %v5043_v39 = vpop.eup %5042 }
 0xa78   :  { %v3592_v40 = vmul.f32 %v5043_v39, %v3584_v12 }
 0xa7a   :  { %v3600_v41 = vmul.f32 %v4494_v31, %v3592_v40 }
 0xa7c   :  { %v3608_v42 = vadd.f32 %v4495_v33, %v3600_v41 }
 0xa7e   :  { %v3609_v43 = vpack.c.bf16 %v3608_v42, %v3608_v42 }
 0xa80   :  { %4534 = vmatmul.mubr.msk.bf16.vlgmr.msra.gmra.mxu0 %vm3221_vm4, %v3609_v43 }
 0xa81   :  { %4553 = vmatprep.mubr.msk.bf16.mxu0 %vm5078_vm6, %v5077_v34  ;;  %4538 = vmatpush3.bf16.msra.mxu0 %v5034_v44 }
 0xa82   :  { %4539 = vmatprep.subr.bf16.mxu0 %v5077_v34 }
 0xa85   :  { %4540 = vmatpush3.bf16.msra.mxu0 %v5035_v45 }
 0xa86   :  { %4541 = vmatprep.subr.bf16.mxu0 %v5077_v34 }
 0xa89   :  { %4542 = vmatpush3.bf16.msra.mxu0 %v5036_v46 }
 0xa8a   :  { %4543 = vmatprep.subr.bf16.mxu0 %v5077_v34 }
 0xa8d   :  { %4544 = vmatpush3.bf16.msra.mxu0 %v5037_v47 }
 0xa8e   :  { %4545 = vmatprep.subr.bf16.mxu0 %v5077_v34 }
 0xa91   :  { %4546 = vmatpush3.bf16.msra.mxu0 %v5038_v52 }
 0xa92   :  { %4547 = vmatprep.subr.bf16.mxu0 %v5077_v34 }
 0xa95   :  { %4548 = vmatpush3.bf16.msra.mxu0 %v5039_v48 }
 0xa96   :  { %4549 = vmatprep.subr.bf16.mxu0 %v5077_v34 }
 0xa99   :  { %4550 = vmatpush3.bf16.msra.mxu0 %v5040_v49 }
 0xa9a   :  { %4551 = vmatprep.subr.bf16.mxu0 %v5077_v34 }
 0xa9d   :  { %4552 = vmatpush3.bf16.msra.mxu0 %v5041_v55 }
 0xb40   :  { %v3686_v59 = vpop.f32.mrf.mxu0 }
 0xb41   :  { %v3687_v58 = vadd.f32 %v4496_v50, %v3686_v59 }
 0xb42   :  { %v4535_v51 = vpop.f32.mrf.mxu0 }
 0xb43   :  { %v3692_v53 = vmul.f32 %v3687_v58, %v3687_v58 }
 0xb44   :  { %v3689_v54 = vpop.f32.mrf.mxu0 }
 0xb45   :  { %v3693_v56 = vmul.f32 %v3692_v53, %v3687_v58 }
 0xb46   :  { %v4536_v57 = vpop.f32.mrf.mxu0 }
 0xb47   :  { %v3694_v60 = vmul.f32 0.044715, %v3693_v56 }
 0xb49   :  { %v3695_v61 = vadd.f32 %v3694_v60, %v3687_v58 }
 0xb4b   :  { %v3696_v62 = vmul.f32 0.7978846, %v3695_v61 }
 0xb4d   :  { %5044 = vtanh.f32 %v3696_v62 }
 0xb5a   :  { %v5045_v63 = vpop.eup %5044 }
 0xb5b   :  { %v3698_v0 = vadd.f32 1.0, %v5045_v63 }
 0xb5d   :  { %v3699_v2 = vmul.f32 0.5, %v3698_v0 }
 0xb5f   :  { %v3700_v6 = vmul.f32 %v3699_v2, %v3687_v58 }
 0xb61   :  { %v3701_v14 = vpack.c.bf16 %v3700_v6, %v3700_v6 }
 0xb63   :  { %4554 = vmatmul.mubr.bf16.vlgmr.msra.gmra.mxu0 %v3701_v14 }
 0xc23   :  { %v3807_v13 = vpop.f32.mrf.mxu0 }
 0xc24   :  { %v3808_v7 = vadd.f32 %v4502_v3, %v3807_v13 }
 0xc25   :  { %v4555_v9 = vpop.f32.mrf.mxu0 }
 0xc26   :  { %v3820_v11 = vsel %vm3819_vm7, %v3808_v7, 0.0 }
 0xc27   :  { %3821 = vadd.xlane.f32.xlu1 %v3820_v11  ;;  %v3810_v16 = vpop.f32.mrf.mxu0 }
 0xc29   :  { %v4556_v15 = vpop.f32.mrf.mxu0 }
 0xc38   :  { %3815 = vperm.xlu1 %4562, %v3808_v7  }
 0xcb0   :  { %v3822_v17 = vpop.xlane.xlu1 %3821 }
 0xcb1   :  { %v3824_v4 = vmul.f32 0.16666667, %v3822_v17 }
 0xcb4   :  { %v3816_v18 = vpop.permute.xlu1 %3815 }
 0xcb5   :  { %v3818_v19 = vadd.f32 %v3816_v18, %v3808_v7 }
 0xcb7   :  { %v3825_v20 = vsub.f32 %v3818_v19, %v3824_v4 }
 0xcb9   :  { %3826 = vst.msk [vmem:[#allocation2] sm:$0x3] %vm3819_vm7, %v3825_v20 }
 0xcba   :  { %5065 = shalt.err (!%p5062_p4)
}
 0xcbb   :  { %3836 = dma.vmem_to_hbm [thread:$0]  %s3834_s5, 32, %s6530_s16, [#allocation3]  }
 0xcbc   :  { %5074 = dma.done.wait [#allocation3], 32  }
 0xcbd   :  { %5075 = vsyncadd [#allocation3], 4294967264 }
 0xcbe   :  { %3840 = vsyncpa [#allocation3], 1 }

</bundles_post_ra>
